<compile_context>
chip_gen: v6e
topology: v6e:2x2x1
jax: 0.10.0
libtpu: 0.0.40
codegen_flags: <defaults>
</compile_context>

<pallas_src>
import jax
import jax.numpy as jnp
from jax.experimental import pallas as pl
from jax.experimental.pallas import tpu as pltpu

# Logical (PyTorch) dims
D_IN, D_H, D_Z = 784, 400, 64
# Lane-padded hidden/latent dims (multiples of 128); x / recon stay at 784.
D_H_P, D_Z_P = 512, 128
TB_MAX = 512  # max batch tile (rows fed to the MXU per grid step)


def _round_up(x, m):
    return (x + m - 1) // m * m


def _cdiv(a, b):
    return (a + b - 1) // b


def _vae_kernel(x_ref, eps_ref,
                w1_ref, b1_ref,
                wmv_ref, bmv_ref,
                w3_ref, b3_ref,
                w4_ref, b4_ref,
                recon_ref, mulv_ref):
    # ---- encode: h1 = relu(x @ W1 + b1) ----
    # x is f32 in HBM (no padded copy); cast to bf16 only for the MXU operand.
    x = x_ref[...].astype(jnp.bfloat16)                          # (TB, 784)
    h1 = jnp.dot(x, w1_ref[...],
                 preferred_element_type=jnp.float32) + b1_ref[...]
    h1 = jnp.maximum(h1, 0.0)                                    # (TB, 512) f32

    # ---- fused fc21|fc22: one matmul -> [mu | logvar], each lane-padded to 128 ----
    mulv = jnp.dot(h1.astype(jnp.bfloat16), wmv_ref[...],
                   preferred_element_type=jnp.float32) + bmv_ref[...]  # (TB, 256)
    mu = mulv[:, :D_Z_P]                                         # vreg-aligned split
    logvar = mulv[:, D_Z_P:]

    # ---- reparameterize: z = mu + eps * exp(0.5 * logvar) ----
    z = mu + eps_ref[...].astype(jnp.float32) * jnp.exp(0.5 * logvar)  # (TB, 128)

    # ---- decode: h3 = relu(z @ W3 + b3); recon = sigmoid(h3 @ W4 + b4) ----
    h3 = jnp.dot(z.astype(jnp.bfloat16), w3_ref[...],
                 preferred_element_type=jnp.float32) + b3_ref[...]
    h3 = jnp.maximum(h3, 0.0)                                    # (TB, 512) f32
    logits = jnp.dot(h3.astype(jnp.bfloat16), w4_ref[...],
                     preferred_element_type=jnp.float32) + b4_ref[...]  # (TB, 784)
    # sigmoid(x) = 0.5 * tanh(0.5 x) + 0.5 : a single EUP transcendental (exact).
    recon = 0.5 * jnp.tanh(0.5 * logits) + 0.5

    recon_ref[...] = recon.astype(recon_ref.dtype)               # bf16 writeback
    mulv_ref[...] = mulv                                         # f32 (mu|logvar)


def init_params(key):
    """Deterministic parameter init matching nn.Linear shapes (stored transposed:
    W is (in_features, out_features) so the kernel computes y = x @ W + b)."""
    ks = jax.random.split(key, 10)

    def linear(kw, kb, fan_in, fan_out):
        bound = 1.0 / jnp.sqrt(fan_in)
        w = jax.random.uniform(kw, (fan_in, fan_out), jnp.float32, -bound, bound)
        b = jax.random.uniform(kb, (1, fan_out), jnp.float32, -bound, bound)
        return w, b

    w1, b1 = linear(ks[0], ks[1], D_IN, D_H)
    w21, b21 = linear(ks[2], ks[3], D_H, D_Z)
    w22, b22 = linear(ks[4], ks[5], D_H, D_Z)
    w3, b3 = linear(ks[6], ks[7], D_Z, D_H)
    w4, b4 = linear(ks[8], ks[9], D_H, D_IN)
    return dict(w1=w1, b1=b1, w21=w21, b21=b21, w22=w22, b22=b22,
                w3=w3, b3=b3, w4=w4, b4=b4)


def prepare_params(p):
    """One-time host-side prep: zero-pad hidden/latent dims to lane-dense sizes,
    fuse fc21/fc22 into one matmul, cast weights to bf16 (biases stay f32).
    x / recon keep their exact 784-wide layout (no padding)."""
    def pad_w(w, r, c):
        w = w.astype(jnp.float32)
        return jnp.zeros((r, c), jnp.float32).at[:w.shape[0], :w.shape[1]].set(w)

    def pad_b(b, c):
        b = b.reshape(1, -1).astype(jnp.float32)
        return jnp.zeros((1, c), jnp.float32).at[:, :b.shape[1]].set(b)

    w1 = pad_w(p["w1"], D_IN, D_H_P).astype(jnp.bfloat16)        # (784, 512)
    b1 = pad_b(p["b1"], D_H_P)                                   # (1, 512)
    wmv = jnp.concatenate([pad_w(p["w21"], D_H_P, D_Z_P),
                           pad_w(p["w22"], D_H_P, D_Z_P)],
                          axis=1).astype(jnp.bfloat16)           # (512, 256)
    bmv = jnp.concatenate([pad_b(p["b21"], D_Z_P),
                           pad_b(p["b22"], D_Z_P)], axis=1)      # (1, 256)
    w3 = pad_w(p["w3"], D_Z_P, D_H_P).astype(jnp.bfloat16)       # (128, 512)
    b3 = pad_b(p["b3"], D_H_P)                                   # (1, 512)
    w4 = pad_w(p["w4"], D_H_P, D_IN).astype(jnp.bfloat16)        # (512, 784)
    b4 = pad_b(p["b4"], D_IN)                                    # (1, 784)
    return dict(w1=w1, b1=b1, wmv=wmv, bmv=bmv, w3=w3, b3=b3, w4=w4, b4=b4)


def vae_forward(x, eps, pp):
    """x: (B, 1, 28, 28) or (B, 784) float32; eps: (B, 64). pp: prepare_params().
    Returns (recon[bf16, B x 784], mu[f32, B x 64], logvar[f32, B x 64])."""
    B = x.shape[0]
    x_flat = x.reshape(B, D_IN).astype(jnp.float32)

    # Batch tiling: at least 2 grid steps whenever the batch allows it (so the
    # grid splits across both v7x TensorCores); tiles capped at TB_MAX=512 and
    # rounded to a multiple of 16 (bf16 sublane packing).
    b_min = _round_up(B, 16)
    n_steps = max(2, _cdiv(b_min, TB_MAX)) if b_min > 16 else 1
    tb = _round_up(_cdiv(b_min, n_steps), 16)
    b_pad = tb * n_steps
    grid = (n_steps,)

    # Only row-pad x when needed (no lane-padded copy of x in HBM any more).
    if b_pad != B:
        x_flat = jnp.pad(x_flat, ((0, b_pad - B), (0, 0)))
    # eps is tiny: pad 64 -> 128 lanes and cast to bf16 (noise; precision moot).
    eps_p = jnp.zeros((b_pad, D_Z_P), jnp.bfloat16).at[:B, :D_Z].set(
        eps.astype(jnp.bfloat16))

    args = [x_flat, eps_p]
    in_specs = [
        pl.BlockSpec((tb, D_IN), lambda i: (i, 0)),    # x: batch-tiled, full 784 lanes
        pl.BlockSpec((tb, D_Z_P), lambda i: (i, 0)),   # eps: batch-tiled
    ]
    for name in ("w1", "b1", "wmv", "bmv", "w3", "b3", "w4", "b4"):
        a = pp[name]
        args.append(a)
        # Constant index_map + single buffer: weights stay VMEM-resident once,
        # without the default double-buffer duplication.
        in_specs.append(pl.BlockSpec(a.shape, lambda i: (0, 0),
                                     pipeline_mode=pl.Buffered(1)))

    flops = 2 * b_pad * (D_IN * D_H_P + D_H_P * 2 * D_Z_P
                         + D_Z_P * D_H_P + D_H_P * D_IN)
    transcendentals = b_pad * (D_Z_P + D_IN)           # exp (z) + tanh (recon)
    bytes_accessed = int(sum(a.size * a.dtype.itemsize for a in args)
                         + b_pad * (D_IN * 2 + 2 * D_Z_P * 4))   # bf16 recon + f32 mulv

    recon_p, mulv_p = pl.pallas_call(
        _vae_kernel,
        out_shape=(jax.ShapeDtypeStruct((b_pad, D_IN), jnp.bfloat16),      # recon
                   jax.ShapeDtypeStruct((b_pad, 2 * D_Z_P), jnp.float32)),  # [mu|logvar]
        grid=grid,
        in_specs=in_specs,
        out_specs=(pl.BlockSpec((tb, D_IN), lambda i: (i, 0)),
                   pl.BlockSpec((tb, 2 * D_Z_P), lambda i: (i, 0))),
        compiler_params=pltpu.CompilerParams(
            dimension_semantics=("parallel",),
            vmem_limit_bytes=40 << 20),    # fits TB=512 tiles; < 64 MiB v7x physical
        cost_estimate=pl.CostEstimate(flops=flops,
                                      transcendentals=transcendentals,
                                      bytes_accessed=bytes_accessed),
    )(*args)

    # recon already has its exact logical width (784); only drop padded rows.
    recon = recon_p if b_pad == B else recon_p[:B]
    mu = mulv_p[:B, :D_Z]
    logvar = mulv_p[:B, D_Z_P:D_Z_P + D_Z]
    return recon, mu, logvar


def vae_forward_ref(x, eps, p):
    """Pure-JAX f32 reference (mirrors the PyTorch module)."""
    B = x.shape[0]
    xf = x.reshape(B, D_IN).astype(jnp.float32)
    h1 = jnp.maximum(xf @ p["w1"] + p["b1"], 0.0)
    mu = h1 @ p["w21"] + p["b21"]
    logvar = h1 @ p["w22"] + p["b22"]
    z = mu + eps * jnp.exp(0.5 * logvar)
    h3 = jnp.maximum(z @ p["w3"] + p["b3"], 0.0)
    recon = jax.nn.sigmoid(h3 @ p["w4"] + p["b4"])
    return recon, mu, logvar


if __name__ == "__main__":
    key = jax.random.PRNGKey(0)
    k_param, k_data = jax.random.split(key)

    params = init_params(k_param)
    pp = prepare_params(params)

    fwd = jax.jit(vae_forward)

    # B=8: single-tile path; B=48: multi-step grid (tb=32, batch row padding).
    for B in (8, 48):
        kx, ke = jax.random.split(jax.random.fold_in(k_data, B))
        x = jax.random.uniform(kx, (B, 1, 28, 28), jnp.float32)   # MNIST-like input
        eps = jax.random.normal(ke, (B, D_Z), jnp.float32)        # reparam noise

        recon, mu, logvar = jax.block_until_ready(fwd(x, eps, pp))

        r_ref, mu_ref, lv_ref = vae_forward_ref(x, eps, params)
        assert recon.shape == (B, D_IN) and mu.shape == (B, D_Z) and logvar.shape == (B, D_Z)
        # bf16 matmul operands / bf16 recon output -> relaxed tolerance
        assert jnp.allclose(recon.astype(jnp.float32), r_ref, atol=2e-2), "recon mismatch"
        assert jnp.allclose(mu, mu_ref, atol=2e-2), "mu mismatch"
        assert jnp.allclose(logvar, lv_ref, atol=2e-2), "logvar mismatch"

    print("KERNEL_OK")
</pallas_src>

<mosaic_0001>
module attributes {stable_mosaic.version = 11 : i64} {
  func.func @_vae_kernel(%arg0: i32, %arg1: memref<16x784xf32, #tpu.memory_space<vmem>>, %arg2: memref<16x128xbf16, #tpu.memory_space<vmem>>, %arg3: memref<784x512xbf16, #tpu.memory_space<vmem>>, %arg4: memref<1x512xf32, #tpu.memory_space<vmem>>, %arg5: memref<512x256xbf16, #tpu.memory_space<vmem>>, %arg6: memref<1x256xf32, #tpu.memory_space<vmem>>, %arg7: memref<128x512xbf16, #tpu.memory_space<vmem>>, %arg8: memref<1x512xf32, #tpu.memory_space<vmem>>, %arg9: memref<512x784xbf16, #tpu.memory_space<vmem>>, %arg10: memref<1x784xf32, #tpu.memory_space<vmem>>, %arg11: memref<16x784xbf16, #tpu.memory_space<vmem>>, %arg12: memref<16x256xf32, #tpu.memory_space<vmem>>) attributes {dimension_semantics = [#tpu.dimension_semantics<parallel>], iteration_bounds = array<i64: 1>, scalar_prefetch = 0 : i64, scratch_operands = 0 : i64, tpu.core_type = #tpu.core_type<tc>, window_params = [{transform_indices = @transform_0, window_bounds = array<i64: 16, 784>}, {transform_indices = @transform_1, window_bounds = array<i64: 16, 128>}, {pipeline_mode = #tpu.pipeline_mode<synchronous>, transform_indices = @transform_2, window_bounds = array<i64: 784, 512>}, {pipeline_mode = #tpu.pipeline_mode<synchronous>, transform_indices = @transform_3, window_bounds = array<i64: 1, 512>}, {pipeline_mode = #tpu.pipeline_mode<synchronous>, transform_indices = @transform_4, window_bounds = array<i64: 512, 256>}, {pipeline_mode = #tpu.pipeline_mode<synchronous>, transform_indices = @transform_5, window_bounds = array<i64: 1, 256>}, {pipeline_mode = #tpu.pipeline_mode<synchronous>, transform_indices = @transform_6, window_bounds = array<i64: 128, 512>}, {pipeline_mode = #tpu.pipeline_mode<synchronous>, transform_indices = @transform_7, window_bounds = array<i64: 1, 512>}, {pipeline_mode = #tpu.pipeline_mode<synchronous>, transform_indices = @transform_8, window_bounds = array<i64: 512, 784>}, {pipeline_mode = #tpu.pipeline_mode<synchronous>, transform_indices = @transform_9, window_bounds = array<i64: 1, 784>}, {transform_indices = @transform_10, window_bounds = array<i64: 16, 784>}, {transform_indices = @transform_11, window_bounds = array<i64: 16, 256>}]} {
    %c0 = arith.constant 0 : index
    %c0_0 = arith.constant 0 : index
    %0 = vector.load %arg1[%c0, %c0_0] : memref<16x784xf32, #tpu.memory_space<vmem>>, vector<16x784xf32>
    %1 = arith.truncf %0 : vector<16x784xf32> to vector<16x784xbf16>
    %c0_1 = arith.constant 0 : index
    %c0_2 = arith.constant 0 : index
    %2 = vector.load %arg3[%c0_1, %c0_2] : memref<784x512xbf16, #tpu.memory_space<vmem>>, vector<784x512xbf16>
    %cst = arith.constant dense<0.000000e+00> : vector<16x512xf32>
    %3 = tpu.matmul %1, %2, %cst {dimension_numbers = #tpu.dot_dimension_numbers<[1], [0], [0], [1], [0, 0, 1, 1], [], []>} : vector<16x784xbf16>, vector<784x512xbf16>, vector<16x512xf32> -> vector<16x512xf32>
    %c0_3 = arith.constant 0 : index
    %c0_4 = arith.constant 0 : index
    %4 = vector.load %arg4[%c0_3, %c0_4] : memref<1x512xf32, #tpu.memory_space<vmem>>, vector<1x512xf32>
    %5 = vector.broadcast %4 : vector<1x512xf32> to vector<16x512xf32>
    %6 = arith.addf %3, %5 : vector<16x512xf32>
    %cst_5 = arith.constant 0.000000e+00 : f32
    %7 = vector.broadcast %cst_5 : f32 to vector<16x512xf32>
    %8 = arith.maximumf %6, %7 : vector<16x512xf32>
    %9 = arith.truncf %8 : vector<16x512xf32> to vector<16x512xbf16>
    %c0_6 = arith.constant 0 : index
    %c0_7 = arith.constant 0 : index
    %10 = vector.load %arg5[%c0_6, %c0_7] : memref<512x256xbf16, #tpu.memory_space<vmem>>, vector<512x256xbf16>
    %cst_8 = arith.constant dense<0.000000e+00> : vector<16x256xf32>
    %11 = tpu.matmul %9, %10, %cst_8 {dimension_numbers = #tpu.dot_dimension_numbers<[1], [0], [0], [1], [0, 0, 1, 1], [], []>} : vector<16x512xbf16>, vector<512x256xbf16>, vector<16x256xf32> -> vector<16x256xf32>
    %c0_9 = arith.constant 0 : index
    %c0_10 = arith.constant 0 : index
    %12 = vector.load %arg6[%c0_9, %c0_10] : memref<1x256xf32, #tpu.memory_space<vmem>>, vector<1x256xf32>
    %13 = vector.broadcast %12 : vector<1x256xf32> to vector<16x256xf32>
    %14 = arith.addf %11, %13 : vector<16x256xf32>
    %15 = vector.extract_strided_slice %14 {offsets = [0, 0], sizes = [16, 128], strides = [1, 1]} : vector<16x256xf32> to vector<16x128xf32>
    %16 = vector.extract_strided_slice %14 {offsets = [0, 128], sizes = [16, 128], strides = [1, 1]} : vector<16x256xf32> to vector<16x128xf32>
    %c0_11 = arith.constant 0 : index
    %c0_12 = arith.constant 0 : index
    %17 = vector.load %arg2[%c0_11, %c0_12] : memref<16x128xbf16, #tpu.memory_space<vmem>>, vector<16x128xbf16>
    %18 = arith.extf %17 : vector<16x128xbf16> to vector<16x128xf32>
    %cst_13 = arith.constant 5.000000e-01 : f32
    %19 = vector.broadcast %cst_13 : f32 to vector<16x128xf32>
    %20 = arith.mulf %19, %16 : vector<16x128xf32>
    %21 = math.exp %20 : vector<16x128xf32>
    %22 = arith.mulf %18, %21 : vector<16x128xf32>
    %23 = arith.addf %15, %22 : vector<16x128xf32>
    %24 = arith.truncf %23 : vector<16x128xf32> to vector<16x128xbf16>
    %c0_14 = arith.constant 0 : index
    %c0_15 = arith.constant 0 : index
    %25 = vector.load %arg7[%c0_14, %c0_15] : memref<128x512xbf16, #tpu.memory_space<vmem>>, vector<128x512xbf16>
    %cst_16 = arith.constant dense<0.000000e+00> : vector<16x512xf32>
    %26 = tpu.matmul %24, %25, %cst_16 {dimension_numbers = #tpu.dot_dimension_numbers<[1], [0], [0], [1], [0, 0, 1, 1], [], []>} : vector<16x128xbf16>, vector<128x512xbf16>, vector<16x512xf32> -> vector<16x512xf32>
    %c0_17 = arith.constant 0 : index
    %c0_18 = arith.constant 0 : index
    %27 = vector.load %arg8[%c0_17, %c0_18] : memref<1x512xf32, #tpu.memory_space<vmem>>, vector<1x512xf32>
    %28 = vector.broadcast %27 : vector<1x512xf32> to vector<16x512xf32>
    %29 = arith.addf %26, %28 : vector<16x512xf32>
    %cst_19 = arith.constant 0.000000e+00 : f32
    %30 = vector.broadcast %cst_19 : f32 to vector<16x512xf32>
    %31 = arith.maximumf %29, %30 : vector<16x512xf32>
    %32 = arith.truncf %31 : vector<16x512xf32> to vector<16x512xbf16>
    %c0_20 = arith.constant 0 : index
    %c0_21 = arith.constant 0 : index
    %33 = vector.load %arg9[%c0_20, %c0_21] : memref<512x784xbf16, #tpu.memory_space<vmem>>, vector<512x784xbf16>
    %cst_22 = arith.constant dense<0.000000e+00> : vector<16x784xf32>
    %34 = tpu.matmul %32, %33, %cst_22 {dimension_numbers = #tpu.dot_dimension_numbers<[1], [0], [0], [1], [0, 0, 1, 1], [], []>} : vector<16x512xbf16>, vector<512x784xbf16>, vector<16x784xf32> -> vector<16x784xf32>
    %c0_23 = arith.constant 0 : index
    %c0_24 = arith.constant 0 : index
    %35 = vector.load %arg10[%c0_23, %c0_24] : memref<1x784xf32, #tpu.memory_space<vmem>>, vector<1x784xf32>
    %36 = vector.broadcast %35 : vector<1x784xf32> to vector<16x784xf32>
    %37 = arith.addf %34, %36 : vector<16x784xf32>
    %cst_25 = arith.constant 5.000000e-01 : f32
    %38 = vector.broadcast %cst_25 : f32 to vector<16x784xf32>
    %39 = arith.mulf %38, %37 : vector<16x784xf32>
    %40 = math.tanh %39 : vector<16x784xf32>
    %cst_26 = arith.constant 5.000000e-01 : f32
    %41 = vector.broadcast %cst_26 : f32 to vector<16x784xf32>
    %42 = arith.mulf %41, %40 : vector<16x784xf32>
    %cst_27 = arith.constant 5.000000e-01 : f32
    %43 = vector.broadcast %cst_27 : f32 to vector<16x784xf32>
    %44 = arith.addf %42, %43 : vector<16x784xf32>
    %45 = arith.truncf %44 : vector<16x784xf32> to vector<16x784xbf16>
    %c0_28 = arith.constant 0 : index
    %c0_29 = arith.constant 0 : index
    %46 = vector.load %arg11[%c0_28, %c0_29] : memref<16x784xbf16, #tpu.memory_space<vmem>>, vector<16x784xbf16>
    tpu.vector_store %arg11[%c0_28, %c0_29], %45 {strides = array<i32>} : memref<16x784xbf16, #tpu.memory_space<vmem>>, vector<16x784xbf16>,
    %c0_30 = arith.constant 0 : index
    %c0_31 = arith.constant 0 : index
    %47 = vector.load %arg12[%c0_30, %c0_31] : memref<16x256xf32, #tpu.memory_space<vmem>>, vector<16x256xf32>
    tpu.vector_store %arg12[%c0_30, %c0_31], %14 {strides = array<i32>} : memref<16x256xf32, #tpu.memory_space<vmem>>, vector<16x256xf32>,
    return
  }
  func.func @transform_0(%arg0: i32) -> (i32, i32) {
    %c0_i32 = arith.constant 0 : i32
    %c0_i32_0 = arith.constant 0 : i32
    return %arg0, %c0_i32 : i32, i32
  }
  func.func @transform_1(%arg0: i32) -> (i32, i32) {
    %c0_i32 = arith.constant 0 : i32
    %c0_i32_0 = arith.constant 0 : i32
    return %arg0, %c0_i32 : i32, i32
  }
  func.func @transform_2(%arg0: i32) -> (i32, i32) {
    %c0_i32 = arith.constant 0 : i32
    %c0_i32_0 = arith.constant 0 : i32
    %c0_i32_1 = arith.constant 0 : i32
    return %c0_i32, %c0_i32_0 : i32, i32
  }
  func.func @transform_3(%arg0: i32) -> (i32, i32) {
    %c0_i32 = arith.constant 0 : i32
    %c0_i32_0 = arith.constant 0 : i32
    %c0_i32_1 = arith.constant 0 : i32
    return %c0_i32, %c0_i32_0 : i32, i32
  }
  func.func @transform_4(%arg0: i32) -> (i32, i32) {
    %c0_i32 = arith.constant 0 : i32
    %c0_i32_0 = arith.constant 0 : i32
    %c0_i32_1 = arith.constant 0 : i32
    return %c0_i32, %c0_i32_0 : i32, i32
  }
  func.func @transform_5(%arg0: i32) -> (i32, i32) {
    %c0_i32 = arith.constant 0 : i32
    %c0_i32_0 = arith.constant 0 : i32
    %c0_i32_1 = arith.constant 0 : i32
    return %c0_i32, %c0_i32_0 : i32, i32
  }
  func.func @transform_6(%arg0: i32) -> (i32, i32) {
    %c0_i32 = arith.constant 0 : i32
    %c0_i32_0 = arith.constant 0 : i32
    %c0_i32_1 = arith.constant 0 : i32
    return %c0_i32, %c0_i32_0 : i32, i32
  }
  func.func @transform_7(%arg0: i32) -> (i32, i32) {
    %c0_i32 = arith.constant 0 : i32
    %c0_i32_0 = arith.constant 0 : i32
    %c0_i32_1 = arith.constant 0 : i32
    return %c0_i32, %c0_i32_0 : i32, i32
  }
  func.func @transform_8(%arg0: i32) -> (i32, i32) {
    %c0_i32 = arith.constant 0 : i32
    %c0_i32_0 = arith.constant 0 : i32
    %c0_i32_1 = arith.constant 0 : i32
    return %c0_i32, %c0_i32_0 : i32, i32
  }
  func.func @transform_9(%arg0: i32) -> (i32, i32) {
    %c0_i32 = arith.constant 0 : i32
    %c0_i32_0 = arith.constant 0 : i32
    %c0_i32_1 = arith.constant 0 : i32
    return %c0_i32, %c0_i32_0 : i32, i32
  }
  func.func @transform_10(%arg0: i32) -> (i32, i32) {
    %c0_i32 = arith.constant 0 : i32
    %c0_i32_0 = arith.constant 0 : i32
    return %arg0, %c0_i32 : i32, i32
  }
  func.func @transform_11(%arg0: i32) -> (i32, i32) {
    %c0_i32 = arith.constant 0 : i32
    %c0_i32_0 = arith.constant 0 : i32
    return %arg0, %c0_i32 : i32, i32
  }
}

</mosaic_0001>

<bundles_post_ra>
// kernel: vae_forward.1
= control target key start
LH: loop header
LB: loop body
LE: loop exit
PB: predicated region body
PF: predicated region fallthrough
CT: control target
= control target key end

     0   :  { %vm1257_vm0 = vcmask 130048   ;;  %vm4314_vm1 = vcmask 125952   ;;  %s7505_s2 = inlined_call_operand.vmem [shape: bf16[784,512], index: 2, kind: input, shape index: {}]   ;;  %s7506_s0 = inlined_call_operand.vmem [shape: f32[16,784], index: 0, kind: input, shape index: {}]   ;;  %s7507_s4 = inlined_call_operand.vmem [shape: bf16[512,256], index: 4, kind: input, shape index: {}]   ;;  %s7508_s3 = inlined_call_operand.vmem [shape: f32[1,512], index: 3, kind: input, shape index: {}]   ;;  %s7509_s6 = inlined_call_operand.vmem [shape: bf16[128,512], index: 6, kind: input, shape index: {}]   ;;  %s7510_s8 = inlined_call_operand.vmem [shape: bf16[512,784], index: 8, kind: input, shape index: {}]   ;;  %s7511_s5 = inlined_call_operand.vmem [shape: f32[1,256], index: 5, kind: input, shape index: {}]   ;;  %s7512_s11 = inlined_call_operand.vmem [shape: f32[16,256], index: 11, kind: output, shape index: {1}]   ;;  %s7513_s1 = inlined_call_operand.vmem [shape: bf16[16,128], index: 1, kind: input, shape index: {}]   ;;  %s7514_s7 = inlined_call_operand.vmem [shape: f32[1,512], index: 7, kind: input, shape index: {}]   ;;  %s7515_s9 = inlined_call_operand.vmem [shape: f32[1,784], index: 9, kind: input, shape index: {}]   ;;  %s7516_s10 = inlined_call_operand.vmem [shape: bf16[16,784], index: 10, kind: output, shape index: {0}]  }
   0x1   :  { %v4915_v0 = vld [vmem:[%s7505_s2 + $0xe4] ss:$16 sps:$4 sm:$0xff]   ;;  %v4919_v2 = vld [vmem:[%s7505_s2 + $0xe0] ss:$16 sps:$4 sm:$0xff]   ;;  %v39_v46 = vld [vmem:[%s7506_s0 + $0x8] sm:$0xff] }
   0x2   :  { %v4917_v1 = vld [vmem:[%s7505_s2 + $0x2e4] ss:$16 sps:$4 sm:$0xff]   ;;  %1261 = vmatprep.subr.bf16.mxu0 %v4915_v0  ;;  %v4920_v3 = vld [vmem:[%s7505_s2 + $0x2e0] ss:$16 sps:$4 sm:$0xff]   ;;  %v41_v48 = vld [vmem:[%s7506_s0 + $0x18] sm:$0xff] }
   0x3   :  { %1304 = vmatprep.subr.bf16.mxu1 %v4917_v1  ;;  %v4921_v4 = vld [vmem:[%s7505_s2 + $0xc4] ss:$16 sps:$4 sm:$0xff]   ;;  %1262 = vmatpush1.bf16.msra.mxu0 %v4919_v2  ;;  %v4925_v6 = vld [vmem:[%s7505_s2 + $0xc0] ss:$16 sps:$4 sm:$0xff]  }
   0x4   :  { %1305 = vmatpush1.bf16.msra.mxu1 %v4920_v3  ;;  %v4923_v5 = vld [vmem:[%s7505_s2 + $0x2c4] ss:$16 sps:$4 sm:$0xff]   ;;  %1263 = vmatprep.subr.bf16.mxu0 %v4921_v4  ;;  %v4926_v7 = vld [vmem:[%s7505_s2 + $0x2c0] ss:$16 sps:$4 sm:$0xff]  }
   0x5   :  { %1306 = vmatprep.subr.bf16.mxu1 %v4923_v5  ;;  %v4927_v8 = vld [vmem:[%s7505_s2 + $0xa4] ss:$16 sps:$4 sm:$0xff]   ;;  %v4931_v10 = vld [vmem:[%s7505_s2 + $0xa0] ss:$16 sps:$4 sm:$0xff]  }
   0x6   :  { %v4929_v9 = vld [vmem:[%s7505_s2 + $0x2a4] ss:$16 sps:$4 sm:$0xff]   ;;  %v4932_v11 = vld [vmem:[%s7505_s2 + $0x2a0] ss:$16 sps:$4 sm:$0xff]  }
   0x7   :  { %1264 = vmatpush1.bf16.msra.mxu0 %v4925_v6  ;;  %v4933_v12 = vld [vmem:[%s7505_s2 + $0x84] ss:$16 sps:$4 sm:$0xff]   ;;  %v4937_v14 = vld [vmem:[%s7505_s2 + $0x80] ss:$16 sps:$4 sm:$0xff]  }
   0x8   :  { %1307 = vmatpush1.bf16.msra.mxu1 %v4926_v7  ;;  %1265 = vmatprep.subr.bf16.mxu0 %v4927_v8  ;;  %v4935_v13 = vld [vmem:[%s7505_s2 + $0x284] ss:$16 sps:$4 sm:$0xff]   ;;  %v4938_v15 = vld [vmem:[%s7505_s2 + $0x280] ss:$16 sps:$4 sm:$0xff]   ;;  %v45_v7 = vld [vmem:[%s7506_s0 + $0x38] sm:$0xff] }
   0x9   :  { %1308 = vmatprep.subr.bf16.mxu1 %v4929_v9  ;;  %v4939_v16 = vld [vmem:[%s7505_s2 + $0x64] ss:$16 sps:$4 sm:$0xff]   ;;  %v4943_v18 = vld [vmem:[%s7505_s2 + $0x60] ss:$16 sps:$4 sm:$0xff]   ;;  %v47_v9 = vld [vmem:[%s7506_s0 + $0x48] sm:$0xff] }
   0xa   :  { %v4941_v17 = vld [vmem:[%s7505_s2 + $0x264] ss:$16 sps:$4 sm:$0xff]   ;;  %v4944_v19 = vld [vmem:[%s7505_s2 + $0x260] ss:$16 sps:$4 sm:$0xff]  }
   0xb   :  { %1266 = vmatpush1.bf16.msra.mxu0 %v4931_v10  ;;  %v4945_v20 = vld [vmem:[%s7505_s2 + $0x44] ss:$16 sps:$4 sm:$0xff]   ;;  %v4949_v22 = vld [vmem:[%s7505_s2 + $0x40] ss:$16 sps:$4 sm:$0xff]  }
   0xc   :  { %1309 = vmatpush1.bf16.msra.mxu1 %v4932_v11  ;;  %1267 = vmatprep.subr.bf16.mxu0 %v4933_v12  ;;  %v4947_v21 = vld [vmem:[%s7505_s2 + $0x244] ss:$16 sps:$4 sm:$0xff]   ;;  %v4950_v23 = vld [vmem:[%s7505_s2 + $0x240] ss:$16 sps:$4 sm:$0xff]  }
   0xd   :  { %1310 = vmatprep.subr.bf16.mxu1 %v4935_v13  ;;  %v4951_v24 = vld [vmem:[%s7505_s2 + $0x24] ss:$16 sps:$4 sm:$0xff]   ;;  %v4955_v26 = vld [vmem:[%s7505_s2 + $0x20] ss:$16 sps:$4 sm:$0xff]  }
   0xe   :  { %v4953_v25 = vld [vmem:[%s7505_s2 + $0x224] ss:$16 sps:$4 sm:$0xff]   ;;  %v4956_v27 = vld [vmem:[%s7505_s2 + $0x220] ss:$16 sps:$4 sm:$0xff]  }
   0xf   :  { %1268 = vmatpush1.bf16.msra.mxu0 %v4937_v14  ;;  %v4957_v28 = vld [vmem:[%s7505_s2 + $0x4] ss:$16 sps:$4 sm:$0xff]   ;;  %v4961_v30 = vld [vmem:[%s7505_s2] ss:$16 sps:$4 sm:$0xff]  }
  0x10   :  { %1311 = vmatpush1.bf16.msra.mxu1 %v4938_v15  ;;  %1269 = vmatprep.subr.bf16.mxu0 %v4939_v16  ;;  %v4959_v29 = vld [vmem:[%s7505_s2 + $0x204] ss:$16 sps:$4 sm:$0xff]   ;;  %v4962_v31 = vld [vmem:[%s7505_s2 + $0x200] ss:$16 sps:$4 sm:$0xff]  }
  0x11   :  { %1312 = vmatprep.subr.bf16.mxu1 %v4941_v17  ;;  %v4963_v32 = vld [vmem:[%s7505_s2 + $0x1e4] ss:$16 sps:$4 sm:$0xff]   ;;  %v4967_v34 = vld [vmem:[%s7505_s2 + $0x1e0] ss:$16 sps:$4 sm:$0xff]   ;;  %v5022_v17 = vld [vmem:[%s7505_s2 + $0xec] ss:$16 sps:$4 sm:$0xff]  }
  0x12   :  { %v4965_v33 = vld [vmem:[%s7505_s2 + $0x3e4] ss:$16 sps:$4 sm:$0xff]   ;;  %v4968_v35 = vld [vmem:[%s7505_s2 + $0x3e0] ss:$16 sps:$4 sm:$0xff]  }
  0x13   :  { %1270 = vmatpush1.bf16.msra.mxu0 %v4943_v18  ;;  %v4969_v36 = vld [vmem:[%s7505_s2 + $0x1c4] ss:$16 sps:$4 sm:$0xff]   ;;  %v4973_v38 = vld [vmem:[%s7505_s2 + $0x1c0] ss:$16 sps:$4 sm:$0xff]  }
  0x14   :  { %1313 = vmatpush1.bf16.msra.mxu1 %v4944_v19  ;;  %1271 = vmatprep.subr.bf16.mxu0 %v4945_v20  ;;  %v4971_v37 = vld [vmem:[%s7505_s2 + $0x3c4] ss:$16 sps:$4 sm:$0xff]   ;;  %v4974_v39 = vld [vmem:[%s7505_s2 + $0x3c0] ss:$16 sps:$4 sm:$0xff]   ;;  %v51_v20 = vld [vmem:[%s7506_s0 + $0x68] sm:$0xff] }
  0x15   :  { %1314 = vmatprep.subr.bf16.mxu1 %v4947_v21  ;;  %v4975_v40 = vld [vmem:[%s7505_s2 + $0x1a4] ss:$16 sps:$4 sm:$0xff]   ;;  %v4979_v42 = vld [vmem:[%s7505_s2 + $0x1a0] ss:$16 sps:$4 sm:$0xff]   ;;  %v5705_v21 = vmov 0  }
  0x16   :  { %v4977_v41 = vld [vmem:[%s7505_s2 + $0x3a4] ss:$16 sps:$4 sm:$0xff]   ;;  %v4980_v43 = vld [vmem:[%s7505_s2 + $0x3a0] ss:$16 sps:$4 sm:$0xff]  }
  0x17   :  { %1272 = vmatpush1.bf16.msra.mxu0 %v4949_v22  ;;  %v4981_v44 = vld [vmem:[%s7505_s2 + $0x184] ss:$16 sps:$4 sm:$0xff]   ;;  %v4985_v50 = vld [vmem:[%s7505_s2 + $0x180] ss:$16 sps:$4 sm:$0xff]  }
  0x18   :  { %1315 = vmatpush1.bf16.msra.mxu1 %v4950_v23  ;;  %1273 = vmatprep.subr.bf16.mxu0 %v4951_v24  ;;  %v4983_v45 = vld [vmem:[%s7505_s2 + $0x384] ss:$16 sps:$4 sm:$0xff]   ;;  %v4986_v51 = vld [vmem:[%s7505_s2 + $0x380] ss:$16 sps:$4 sm:$0xff]   ;;  %v5020_v24 = vld [vmem:[%s7505_s2 + $0xe8] ss:$16 sps:$4 sm:$0xff]  }
  0x19   :  { %1316 = vmatprep.subr.bf16.mxu1 %v4953_v25  ;;  %v46_v47 = vld [vmem:[%s7506_s0 + $0x40] sm:$0xff]  ;;  %v48_v49 = vld [vmem:[%s7506_s0 + $0x50] sm:$0xff] }
  0x1a   :  { %v4987_v52 = vld [vmem:[%s7505_s2 + $0x164] ss:$16 sps:$4 sm:$0xff]   ;;  %v5925_v53 = vpack.c.bf16 %v46_v47, %v39_v46  ;;  %v5927_v54 = vpack.c.bf16 %v48_v49, %v41_v48  ;;  %v4991_v56 = vld [vmem:[%s7505_s2 + $0x160] ss:$16 sps:$4 sm:$0xff]   ;;  %v5050_v47 = vld [vmem:[%s7505_s2 + $0x48] ss:$16 sps:$4 sm:$0xff]  }
  0x1b   :  { %1274 = vmatpush1.bf16.msra.mxu0 %v4955_v26  ;;  %v4989_v55 = vld [vmem:[%s7505_s2 + $0x364] ss:$16 sps:$4 sm:$0xff]   ;;  %v4992_v57 = vld [vmem:[%s7505_s2 + $0x360] ss:$16 sps:$4 sm:$0xff]   ;;  %v5028_v26 = vld [vmem:[%s7505_s2 + $0xcc] ss:$16 sps:$4 sm:$0xff]  }
  0x1c   :  { %1317 = vmatpush1.bf16.msra.mxu1 %v4956_v27  ;;  %1275 = vmatprep.subr.bf16.mxu0 %v4957_v28  ;;  %v4993_v58 = vld [vmem:[%s7505_s2 + $0x144] ss:$16 sps:$4 sm:$0xff]   ;;  %v4997_v60 = vld [vmem:[%s7505_s2 + $0x140] ss:$16 sps:$4 sm:$0xff]   ;;  %v5026_v28 = vld [vmem:[%s7505_s2 + $0xc8] ss:$16 sps:$4 sm:$0xff]  }
  0x1d   :  { %1318 = vmatprep.subr.bf16.mxu1 %v4959_v29  ;;  %1293 = vmatprep.mubr.bf16.mxu0 %v5925_v53  ;;  %v4995_v59 = vld [vmem:[%s7505_s2 + $0x344] ss:$16 sps:$4 sm:$0xff]   ;;  %v4998_v61 = vld [vmem:[%s7505_s2 + $0x340] ss:$16 sps:$4 sm:$0xff]   ;;  %v5058_v49 = vld [vmem:[%s7505_s2 + $0x2c] ss:$16 sps:$4 sm:$0xff]  }
  0x1e   :  { %1336 = vmatprep.mubr.bf16.mxu1 %v5927_v54  ;;  %v4999_v62 = vld [vmem:[%s7505_s2 + $0x124] ss:$16 sps:$4 sm:$0xff]   ;;  %v5003_v0 = vld [vmem:[%s7505_s2 + $0x120] ss:$16 sps:$4 sm:$0xff]  }
  0x1f   :  { %1276 = vmatpush1.bf16.msra.mxu0 %v4961_v30  ;;  %v5001_v63 = vld [vmem:[%s7505_s2 + $0x324] ss:$16 sps:$4 sm:$0xff]   ;;  %v5004_v1 = vld [vmem:[%s7505_s2 + $0x320] ss:$16 sps:$4 sm:$0xff]   ;;  %v5034_v30 = vld [vmem:[%s7505_s2 + $0xac] ss:$16 sps:$4 sm:$0xff]  }
  0x20   :  { %1319 = vmatpush1.bf16.msra.mxu1 %v4962_v31  ;;  %1277 = vmatprep.subr.bf16.mxu0 %v4963_v32  ;;  %v5005_v2 = vld [vmem:[%s7505_s2 + $0x104] ss:$16 sps:$4 sm:$0xff]   ;;  %v5009_v4 = vld [vmem:[%s7505_s2 + $0x100] ss:$16 sps:$4 sm:$0xff]   ;;  %v5032_v32 = vld [vmem:[%s7505_s2 + $0xa8] ss:$16 sps:$4 sm:$0xff]  }
  0x21   :  { %1320 = vmatprep.subr.bf16.mxu1 %v4965_v33  ;;  %v5007_v3 = vld [vmem:[%s7505_s2 + $0x304] ss:$16 sps:$4 sm:$0xff]   ;;  %v5010_v5 = vld [vmem:[%s7505_s2 + $0x300] ss:$16 sps:$4 sm:$0xff]  }
  0x22   :  { %v38_v6 = vld [vmem:[%s7506_s0] sm:$0xff]  ;;  %v40_v8 = vld [vmem:[%s7506_s0 + $0x10] sm:$0xff] }
  0x23   :  { %1278 = vmatpush2.bf16.msra.mxu0 %v4967_v34  ;;  %v5013_v10 = vld [vmem:[%s7505_s2 + $0x4e4] ss:$16 sps:$4 sm:$0xff]   ;;  %v5994_v12 = vpack.c.bf16 %v45_v7, %v38_v6  ;;  %v5996_v13 = vpack.c.bf16 %v47_v9, %v40_v8  ;;  %v5011_v14 = vld [vmem:[%s7505_s2 + $0x4e0] ss:$16 sps:$4 sm:$0xff]   ;;  %v5040_v34 = vld [vmem:[%s7505_s2 + $0x8c] ss:$16 sps:$4 sm:$0xff]  }
  0x24   :  { %1321 = vmatpush2.bf16.msra.mxu1 %v4968_v35  ;;  %1279 = vmatprep.subr.bf16.mxu0 %v4969_v36  ;;  %v5016_v11 = vld [vmem:[%s7505_s2 + $0x604] ss:$16 sps:$4 sm:$0xff]   ;;  %v5014_v15 = vld [vmem:[%s7505_s2 + $0x600] ss:$16 sps:$4 sm:$0xff]   ;;  %v5038_v36 = vld [vmem:[%s7505_s2 + $0x88] ss:$16 sps:$4 sm:$0xff]  }
  0x25   :  { %1322 = vmatprep.subr.bf16.mxu1 %v4971_v37  ;;  %v5019_v16 = vld [vmem:[%s7505_s2 + $0x4c4] ss:$16 sps:$4 sm:$0xff]   ;;  %v5017_v18 = vld [vmem:[%s7505_s2 + $0x4c0] ss:$16 sps:$4 sm:$0xff]   ;;  %v5088_v6 = vld [vmem:[%s7505_s2 + $0x18c] ss:$16 sps:$4 sm:$0xff]  }
  0x26   :  { %v44_v19 = vld [vmem:[%s7506_s0 + $0x30] sm:$0xff]  ;;  %v5086_v8 = vld [vmem:[%s7505_s2 + $0x188] ss:$16 sps:$4 sm:$0xff]  }
  0x27   :  { %1280 = vmatpush2.bf16.msra.mxu0 %v4973_v38  ;;  %v5025_v22 = vld [vmem:[%s7505_s2 + $0x4a4] ss:$16 sps:$4 sm:$0xff]   ;;  %v6025_v23 = vpack.c.bf16 %v51_v20, %v44_v19  ;;  %v5023_v25 = vld [vmem:[%s7505_s2 + $0x4a0] ss:$16 sps:$4 sm:$0xff]   ;;  %v5046_v38 = vld [vmem:[%s7505_s2 + $0x6c] ss:$16 sps:$4 sm:$0xff]  }
  0x28   :  { %1323 = vmatpush2.bf16.msra.mxu1 %v4974_v39  ;;  %1281 = vmatprep.subr.bf16.mxu0 %v4975_v40  ;;  %v5031_v27 = vld [vmem:[%s7505_s2 + $0x484] ss:$16 sps:$4 sm:$0xff]   ;;  %v5029_v29 = vld [vmem:[%s7505_s2 + $0x480] ss:$16 sps:$4 sm:$0xff]   ;;  %v5044_v40 = vld [vmem:[%s7505_s2 + $0x68] ss:$16 sps:$4 sm:$0xff]  }
  0x29   :  { %1324 = vmatprep.subr.bf16.mxu1 %v4977_v41  ;;  %v5037_v31 = vld [vmem:[%s7505_s2 + $0x464] ss:$16 sps:$4 sm:$0xff]   ;;  %v5035_v33 = vld [vmem:[%s7505_s2 + $0x460] ss:$16 sps:$4 sm:$0xff]   ;;  %v43_v41 = vld [vmem:[%s7506_s0 + $0x28] sm:$0xff] }
  0x2a   :  { %v5043_v35 = vld [vmem:[%s7505_s2 + $0x444] ss:$16 sps:$4 sm:$0xff]   ;;  %v5041_v37 = vld [vmem:[%s7505_s2 + $0x440] ss:$16 sps:$4 sm:$0xff]  }
  0x2b   :  { %1282 = vmatpush2.bf16.msra.mxu0 %v4979_v42  ;;  %v5049_v39 = vld [vmem:[%s7505_s2 + $0x424] ss:$16 sps:$4 sm:$0xff]   ;;  %v5053_v48 = vld [vmem:[%s7505_s2 + $0x400] ss:$16 sps:$4 sm:$0xff]  }
  0x2c   :  { %1325 = vmatpush2.bf16.msra.mxu1 %v4980_v43  ;;  %1283 = vmatprep.subr.bf16.mxu0 %v4981_v44  ;;  %v50_v42 = vld [vmem:[%s7506_s0 + $0x60] sm:$0xff] }
  0x2d   :  { %1326 = vmatprep.subr.bf16.mxu1 %v4983_v45  ;;  %v5047_v43 = vld [vmem:[%s7505_s2 + $0x420] ss:$16 sps:$4 sm:$0xff]   ;;  %v6090_v44 = vpack.c.bf16 %v50_v42, %v43_v41  ;;  %v5052_v45 = vld [vmem:[%s7505_s2 + $0x4c] ss:$16 sps:$4 sm:$0xff]   ;;  %v5055_v46 = vld [vmem:[%s7505_s2 + $0x404] ss:$16 sps:$4 sm:$0xff]  }
  0x2e   :  { %v5091_v7 = vld [vmem:[%s7505_s2 + $0x544] ss:$16 sps:$4 sm:$0xff]   ;;  %v5089_v9 = vld [vmem:[%s7505_s2 + $0x540] ss:$16 sps:$4 sm:$0xff]   ;;  %v5128_v41 = vld [vmem:[%s7505_s2 + $0x4a8] ss:$16 sps:$4 sm:$0xff]  }
  0x2f   :  { %1284 = vmatpush2.bf16.msra.mxu0 %v4985_v50  ;;  %v5061_v50 = vld [vmem:[%s7505_s2 + $0x5e4] ss:$16 sps:$4 sm:$0xff]   ;;  %v5101_v19 = vld [vmem:[%s7505_s2 + $0x500] ss:$16 sps:$4 sm:$0xff]   ;;  %v5131_v42 = vld [vmem:[%s7505_s2 + $0x268] ss:$16 sps:$4 sm:$0xff]  }
  0x30   :  { %1327 = vmatpush2.bf16.msra.mxu1 %v4986_v51  ;;  %1285 = vmatprep.subr.bf16.mxu0 %v4987_v52  ;;  %v5056_v51 = vld [vmem:[%s7505_s2 + $0x28] ss:$16 sps:$4 sm:$0xff]   ;;  %v5059_v52 = vld [vmem:[%s7505_s2 + $0x5e0] ss:$16 sps:$4 sm:$0xff]  }
  0x31   :  { %1328 = vmatprep.subr.bf16.mxu1 %v4989_v55  ;;  %v5067_v55 = vld [vmem:[%s7505_s2 + $0x5c4] ss:$16 sps:$4 sm:$0xff]  }
  0x32   :  { %v42_v20 = vld [vmem:[%s7506_s0 + $0x20] sm:$0xff] }
  0x33   :  { %1286 = vmatpush2.bf16.msra.mxu0 %v4991_v56  ;;  %v5062_v56 = vld [vmem:[%s7505_s2 + $0x8] ss:$16 sps:$4 sm:$0xff]  }
  0x34   :  { %1329 = vmatpush2.bf16.msra.mxu1 %v4992_v57  ;;  %1287 = vmatprep.subr.bf16.mxu0 %v4993_v58  ;;  %v5065_v57 = vld [vmem:[%s7505_s2 + $0x5c0] ss:$16 sps:$4 sm:$0xff]   ;;  %v5070_v58 = vld [vmem:[%s7505_s2 + $0x1ec] ss:$16 sps:$4 sm:$0xff]  }
  0x35   :  { %1330 = vmatprep.subr.bf16.mxu1 %v4995_v59  ;;  %v5073_v59 = vld [vmem:[%s7505_s2 + $0x5a4] ss:$16 sps:$4 sm:$0xff]  }
  0x37   :  { %1288 = vmatpush2.bf16.msra.mxu0 %v4997_v60  ;;  %v5068_v60 = vld [vmem:[%s7505_s2 + $0x1e8] ss:$16 sps:$4 sm:$0xff]  }
  0x38   :  { %1331 = vmatpush2.bf16.msra.mxu1 %v4998_v61  ;;  %1289 = vmatprep.subr.bf16.mxu0 %v4999_v62  ;;  %v5071_v61 = vld [vmem:[%s7505_s2 + $0x5a0] ss:$16 sps:$4 sm:$0xff]   ;;  %v5076_v62 = vld [vmem:[%s7505_s2 + $0x1cc] ss:$16 sps:$4 sm:$0xff]  }
  0x39   :  { %1332 = vmatprep.subr.bf16.mxu1 %v5001_v63  ;;  %v5079_v63 = vld [vmem:[%s7505_s2 + $0x584] ss:$16 sps:$4 sm:$0xff]  }
  0x3b   :  { %1290 = vmatpush2.bf16.msra.mxu0 %v5003_v0  ;;  %v5074_v0 = vld [vmem:[%s7505_s2 + $0x1c8] ss:$16 sps:$4 sm:$0xff]  }
  0x3c   :  { %1333 = vmatpush2.bf16.msra.mxu1 %v5004_v1  ;;  %1291 = vmatprep.subr.bf16.mxu0 %v5005_v2  ;;  %v5077_v1 = vld [vmem:[%s7505_s2 + $0x580] ss:$16 sps:$4 sm:$0xff]   ;;  %v5082_v2 = vld [vmem:[%s7505_s2 + $0x1ac] ss:$16 sps:$4 sm:$0xff]  }
  0x3d   :  { %1334 = vmatprep.subr.bf16.mxu1 %v5007_v3  ;;  %v5085_v3 = vld [vmem:[%s7505_s2 + $0x564] ss:$16 sps:$4 sm:$0xff]  }
  0x3f   :  { %1292 = vmatpush2.bf16.msra.mxu0 %v5009_v4  ;;  %v5080_v4 = vld [vmem:[%s7505_s2 + $0x1a8] ss:$16 sps:$4 sm:$0xff]  }
  0x40   :  { %1335 = vmatpush2.bf16.msra.mxu1 %v5010_v5  ;;  %1347 = vmatprep.subr.bf16.mxu0 %v5013_v10  ;;  %v5083_v5 = vld [vmem:[%s7505_s2 + $0x560] ss:$16 sps:$4 sm:$0xff]   ;;  %v5094_v10 = vld [vmem:[%s7505_s2 + $0x16c] ss:$16 sps:$4 sm:$0xff]  }
  0x41   :  { %1404 = vmatprep.subr.bf16.mxu1 %v5016_v11  ;;  %v5097_v11 = vld [vmem:[%s7505_s2 + $0x524] ss:$16 sps:$4 sm:$0xff]  }
  0x42   :  { %1294 = vmatmul.mubr.bf16.vlgmr.msra.gmra.mxu0 %v5994_v12 }
  0x43   :  { %1337 = vmatmul.mubr.bf16.vlgmr.msra.gmra.mxu1 %v5996_v13  ;;  %1348 = vmatpush1.bf16.msra.mxu0 %v5011_v14  ;;  %v5092_v14 = vld [vmem:[%s7505_s2 + $0x168] ss:$16 sps:$4 sm:$0xff]  }
  0x44   :  { %1405 = vmatpush1.bf16.msra.mxu1 %v5014_v15  ;;  %1349 = vmatprep.subr.bf16.mxu0 %v5019_v16  ;;  %v5095_v15 = vld [vmem:[%s7505_s2 + $0x520] ss:$16 sps:$4 sm:$0xff]   ;;  %v5100_v16 = vld [vmem:[%s7505_s2 + $0x14c] ss:$16 sps:$4 sm:$0xff]  }
  0x45   :  { %1422 = vmatprep.mubr.bf16.mxu1 %v5705_v21  ;;  %1433 = vmatprep.subr.bf16.mxu1 %v5022_v17  ;;  %v5103_v17 = vld [vmem:[%s7505_s2 + $0x504] ss:$16 sps:$4 sm:$0xff]  }
  0x46   :  { %1379 = vmatprep.mubr.bf16.mxu0 %v6090_v44 }
  0x47   :  { %1350 = vmatpush1.bf16.msra.mxu0 %v5017_v18  ;;  %v5098_v18 = vld [vmem:[%s7505_s2 + $0x148] ss:$16 sps:$4 sm:$0xff]  }
  0x48   :  { %1351 = vmatprep.subr.bf16.mxu0 %v5025_v22  ;;  %v49_v22 = vld [vmem:[%s7506_s0 + $0x58] sm:$0xff] }
  0x4b   :  { %4528 = vmatmul.mubr.msk.bf16.vlgmr.msra.gmra.mxu1 %vm1257_vm0, %v6025_v23  ;;  %1352 = vmatpush1.bf16.msra.mxu0 %v5023_v25  ;;  %v5109_v25 = vld [vmem:[%s7505_s2 + $0x2ec] ss:$16 sps:$4 sm:$0xff]  }
  0x4c   :  { %1434 = vmatpush1.bf16.msra.mxu1 %v5020_v24  ;;  %1353 = vmatprep.subr.bf16.mxu0 %v5031_v27  ;;  %v5106_v24 = vld [vmem:[%s7505_s2 + $0x12c] ss:$16 sps:$4 sm:$0xff]   ;;  %v5104_v27 = vld [vmem:[%s7505_s2 + $0x128] ss:$16 sps:$4 sm:$0xff]  }
  0x4d   :  { %1435 = vmatprep.subr.bf16.mxu1 %v5028_v26  ;;  %1465 = vmatprep.mubr.bf16.mxu1 %v5925_v53  ;;  %v5064_v53 = vld [vmem:[%s7505_s2 + $0xc] ss:$16 sps:$4 sm:$0xff]   ;;  %v6213_v26 = vpack.c.bf16 %v49_v22, %v42_v20  ;;  %v5188_v20 = vld [vmem:[%s7505_s2 + $0x568] ss:$16 sps:$4 sm:$0xff]  }
  0x4e   :  { %v5191_v22 = vld [vmem:[%s7505_s2 + $0x328] ss:$16 sps:$4 sm:$0xff]  }
  0x4f   :  { %1354 = vmatpush1.bf16.msra.mxu0 %v5029_v29  ;;  %v5112_v29 = vld [vmem:[%s7505_s2 + $0x10c] ss:$16 sps:$4 sm:$0xff]  }
  0x50   :  { %1436 = vmatpush1.bf16.msra.mxu1 %v5026_v28  ;;  %1355 = vmatprep.subr.bf16.mxu0 %v5037_v31  ;;  %v5107_v28 = vld [vmem:[%s7505_s2 + $0x2e8] ss:$16 sps:$4 sm:$0xff]  }
  0x51   :  { %1437 = vmatprep.subr.bf16.mxu1 %v5034_v30  ;;  %v5115_v30 = vld [vmem:[%s7505_s2 + $0x2cc] ss:$16 sps:$4 sm:$0xff]   ;;  %v5110_v31 = vld [vmem:[%s7505_s2 + $0x108] ss:$16 sps:$4 sm:$0xff]  }
  0x53   :  { %1356 = vmatpush1.bf16.msra.mxu0 %v5035_v33  ;;  %v5118_v33 = vld [vmem:[%s7505_s2 + $0x4ec] ss:$16 sps:$4 sm:$0xff]  }
  0x54   :  { %1438 = vmatpush1.bf16.msra.mxu1 %v5032_v32  ;;  %1357 = vmatprep.subr.bf16.mxu0 %v5043_v35  ;;  %v5113_v32 = vld [vmem:[%s7505_s2 + $0x2c8] ss:$16 sps:$4 sm:$0xff]  }
  0x55   :  { %1439 = vmatprep.subr.bf16.mxu1 %v5040_v34  ;;  %v5121_v34 = vld [vmem:[%s7505_s2 + $0x2ac] ss:$16 sps:$4 sm:$0xff]   ;;  %v5116_v35 = vld [vmem:[%s7505_s2 + $0x4e8] ss:$16 sps:$4 sm:$0xff]  }
  0x57   :  { %1358 = vmatpush1.bf16.msra.mxu0 %v5041_v37  ;;  %v5124_v37 = vld [vmem:[%s7505_s2 + $0x4cc] ss:$16 sps:$4 sm:$0xff]  }
  0x58   :  { %1440 = vmatpush1.bf16.msra.mxu1 %v5038_v36  ;;  %1359 = vmatprep.subr.bf16.mxu0 %v5049_v39  ;;  %v5119_v36 = vld [vmem:[%s7505_s2 + $0x2a8] ss:$16 sps:$4 sm:$0xff]  }
  0x59   :  { %1441 = vmatprep.subr.bf16.mxu1 %v5046_v38  ;;  %v5122_v38 = vld [vmem:[%s7505_s2 + $0x4c8] ss:$16 sps:$4 sm:$0xff]  }
  0x5a   :  { %v5125_v39 = vld [vmem:[%s7505_s2 + $0x288] ss:$16 sps:$4 sm:$0xff]  }
  0x5b   :  { %1360 = vmatpush1.bf16.msra.mxu0 %v5047_v43  ;;  %v5136_v43 = vld [vmem:[%s7505_s2 + $0x48c] ss:$16 sps:$4 sm:$0xff]  }
  0x5c   :  { %1442 = vmatpush1.bf16.msra.mxu1 %v5044_v40  ;;  %1361 = vmatprep.subr.bf16.mxu0 %v5055_v46  ;;  %v5130_v40 = vld [vmem:[%s7505_s2 + $0x4ac] ss:$16 sps:$4 sm:$0xff]   ;;  %v5137_v46 = vld [vmem:[%s7505_s2 + $0x248] ss:$16 sps:$4 sm:$0xff]  }
  0x5d   :  { %1443 = vmatprep.subr.bf16.mxu1 %v5052_v45  ;;  %v5134_v45 = vld [vmem:[%s7505_s2 + $0x488] ss:$16 sps:$4 sm:$0xff]  }
  0x5f   :  { %1362 = vmatpush1.bf16.msra.mxu0 %v5053_v48  ;;  %v5145_v48 = vld [vmem:[%s7505_s2 + $0x22c] ss:$16 sps:$4 sm:$0xff]  }
  0x60   :  { %1444 = vmatpush1.bf16.msra.mxu1 %v5050_v47  ;;  %1363 = vmatprep.subr.bf16.mxu0 %v5061_v50  ;;  %v5142_v47 = vld [vmem:[%s7505_s2 + $0x46c] ss:$16 sps:$4 sm:$0xff]   ;;  %v5143_v50 = vld [vmem:[%s7505_s2 + $0x228] ss:$16 sps:$4 sm:$0xff]  }
  0x61   :  { %1445 = vmatprep.subr.bf16.mxu1 %v5058_v49  ;;  %v5140_v49 = vld [vmem:[%s7505_s2 + $0x468] ss:$16 sps:$4 sm:$0xff]  }
  0x63   :  { %1364 = vmatpush2.bf16.msra.mxu0 %v5059_v52  ;;  %v5151_v52 = vld [vmem:[%s7505_s2 + $0x20c] ss:$16 sps:$4 sm:$0xff]  }
  0x64   :  { %1446 = vmatpush1.bf16.msra.mxu1 %v5056_v51  ;;  %1365 = vmatprep.subr.bf16.mxu0 %v5067_v55  ;;  %v5148_v51 = vld [vmem:[%s7505_s2 + $0x44c] ss:$16 sps:$4 sm:$0xff]   ;;  %v5149_v55 = vld [vmem:[%s7505_s2 + $0x208] ss:$16 sps:$4 sm:$0xff]  }
  0x65   :  { %1447 = vmatprep.subr.bf16.mxu1 %v5064_v53  ;;  %v5146_v53 = vld [vmem:[%s7505_s2 + $0x448] ss:$16 sps:$4 sm:$0xff]  }
  0x67   :  { %1366 = vmatpush2.bf16.msra.mxu0 %v5065_v57  ;;  %v5157_v57 = vld [vmem:[%s7505_s2 + $0x3ec] ss:$16 sps:$4 sm:$0xff]  }
  0x68   :  { %1448 = vmatpush1.bf16.msra.mxu1 %v5062_v56  ;;  %1367 = vmatprep.subr.bf16.mxu0 %v5073_v59  ;;  %v5154_v56 = vld [vmem:[%s7505_s2 + $0x42c] ss:$16 sps:$4 sm:$0xff]   ;;  %v5155_v59 = vld [vmem:[%s7505_s2 + $0x3e8] ss:$16 sps:$4 sm:$0xff]  }
  0x69   :  { %1449 = vmatprep.subr.bf16.mxu1 %v5070_v58  ;;  %v5152_v58 = vld [vmem:[%s7505_s2 + $0x428] ss:$16 sps:$4 sm:$0xff]  }
  0x6b   :  { %1368 = vmatpush2.bf16.msra.mxu0 %v5071_v61  ;;  %v5163_v61 = vld [vmem:[%s7505_s2 + $0x3cc] ss:$16 sps:$4 sm:$0xff]  }
  0x6c   :  { %1450 = vmatpush2.bf16.msra.mxu1 %v5068_v60  ;;  %1369 = vmatprep.subr.bf16.mxu0 %v5079_v63  ;;  %v5160_v60 = vld [vmem:[%s7505_s2 + $0x40c] ss:$16 sps:$4 sm:$0xff]   ;;  %v5161_v63 = vld [vmem:[%s7505_s2 + $0x3c8] ss:$16 sps:$4 sm:$0xff]  }
  0x6d   :  { %1451 = vmatprep.subr.bf16.mxu1 %v5076_v62  ;;  %v5158_v62 = vld [vmem:[%s7505_s2 + $0x408] ss:$16 sps:$4 sm:$0xff]  }
  0x6f   :  { %1370 = vmatpush2.bf16.msra.mxu0 %v5077_v1  ;;  %v5169_v1 = vld [vmem:[%s7505_s2 + $0x3ac] ss:$16 sps:$4 sm:$0xff]  }
  0x70   :  { %1452 = vmatpush2.bf16.msra.mxu1 %v5074_v0  ;;  %1371 = vmatprep.subr.bf16.mxu0 %v5085_v3  ;;  %v5166_v0 = vld [vmem:[%s7505_s2 + $0x5ec] ss:$16 sps:$4 sm:$0xff]   ;;  %v5167_v3 = vld [vmem:[%s7505_s2 + $0x3a8] ss:$16 sps:$4 sm:$0xff]  }
  0x71   :  { %1453 = vmatprep.subr.bf16.mxu1 %v5082_v2  ;;  %v5164_v2 = vld [vmem:[%s7505_s2 + $0x5e8] ss:$16 sps:$4 sm:$0xff]  }
  0x73   :  { %1372 = vmatpush2.bf16.msra.mxu0 %v5083_v5  ;;  %v5175_v5 = vld [vmem:[%s7505_s2 + $0x38c] ss:$16 sps:$4 sm:$0xff]  }
  0x74   :  { %1454 = vmatpush2.bf16.msra.mxu1 %v5080_v4  ;;  %1373 = vmatprep.subr.bf16.mxu0 %v5091_v7  ;;  %v5172_v4 = vld [vmem:[%s7505_s2 + $0x5cc] ss:$16 sps:$4 sm:$0xff]   ;;  %v5173_v7 = vld [vmem:[%s7505_s2 + $0x388] ss:$16 sps:$4 sm:$0xff]  }
  0x75   :  { %1455 = vmatprep.subr.bf16.mxu1 %v5088_v6  ;;  %v5170_v6 = vld [vmem:[%s7505_s2 + $0x5c8] ss:$16 sps:$4 sm:$0xff]  }
  0x77   :  { %1374 = vmatpush2.bf16.msra.mxu0 %v5089_v9  ;;  %v5181_v9 = vld [vmem:[%s7505_s2 + $0x36c] ss:$16 sps:$4 sm:$0xff]  }
  0x78   :  { %1456 = vmatpush2.bf16.msra.mxu1 %v5086_v8  ;;  %1375 = vmatprep.subr.bf16.mxu0 %v5097_v11  ;;  %v5178_v8 = vld [vmem:[%s7505_s2 + $0x5ac] ss:$16 sps:$4 sm:$0xff]   ;;  %v5179_v11 = vld [vmem:[%s7505_s2 + $0x368] ss:$16 sps:$4 sm:$0xff]  }
  0x79   :  { %1457 = vmatprep.subr.bf16.mxu1 %v5094_v10  ;;  %v5176_v10 = vld [vmem:[%s7505_s2 + $0x5a8] ss:$16 sps:$4 sm:$0xff]  }
  0x7b   :  { %1376 = vmatpush2.bf16.msra.mxu0 %v5095_v15  ;;  %v5187_v15 = vld [vmem:[%s7505_s2 + $0x34c] ss:$16 sps:$4 sm:$0xff]  }
  0x7c   :  { %1458 = vmatpush2.bf16.msra.mxu1 %v5092_v14  ;;  %1377 = vmatprep.subr.bf16.mxu0 %v5103_v17  ;;  %v5184_v14 = vld [vmem:[%s7505_s2 + $0x58c] ss:$16 sps:$4 sm:$0xff]   ;;  %v5185_v17 = vld [vmem:[%s7505_s2 + $0x348] ss:$16 sps:$4 sm:$0xff]  }
  0x7d   :  { %1459 = vmatprep.subr.bf16.mxu1 %v5100_v16  ;;  %v5182_v16 = vld [vmem:[%s7505_s2 + $0x588] ss:$16 sps:$4 sm:$0xff]  }
  0x7f   :  { %1378 = vmatpush2.bf16.msra.mxu0 %v5101_v19  ;;  %v5193_v19 = vld [vmem:[%s7505_s2 + $0x32c] ss:$16 sps:$4 sm:$0xff]  }
  0x80   :  { %1460 = vmatpush2.bf16.msra.mxu1 %v5098_v18  ;;  %1476 = vmatprep.subr.bf16.mxu0 %v5109_v25  ;;  %v5190_v18 = vld [vmem:[%s7505_s2 + $0x56c] ss:$16 sps:$4 sm:$0xff]  }
  0x81   :  { %1461 = vmatprep.subr.bf16.mxu1 %v5106_v24  ;;  %v5196_v24 = vld [vmem:[%s7505_s2 + $0x54c] ss:$16 sps:$4 sm:$0xff]  }
  0x82   :  { %1380 = vmatmul.mubr.bf16.vlgmr.msra.gmra.mxu0 %v6213_v26  ;;  %v5199_v25 = vld [vmem:[%s7505_s2 + $0x30c] ss:$16 sps:$4 sm:$0xff]  }
  0x83   :  { %1477 = vmatpush1.bf16.msra.mxu0 %v5107_v28  ;;  %1508 = vmatprep.mubr.bf16.mxu0 %v5927_v54  ;;  %v5127_v54 = vld [vmem:[%s7505_s2 + $0x28c] ss:$16 sps:$4 sm:$0xff]   ;;  %v5197_v28 = vld [vmem:[%s7505_s2 + $0x308] ss:$16 sps:$4 sm:$0xff]  }
  0x84   :  { %1462 = vmatpush2.bf16.msra.mxu1 %v5104_v27  ;;  %1478 = vmatprep.subr.bf16.mxu0 %v5115_v30  ;;  %v5194_v27 = vld [vmem:[%s7505_s2 + $0x548] ss:$16 sps:$4 sm:$0xff]   ;;  %v5205_v30 = vld [vmem:[%s7505_s2 + $0x60c] ss:$16 sps:$4 sm:$0xff]  }
  0x85   :  { %1463 = vmatprep.subr.bf16.mxu1 %v5112_v29  ;;  %v5202_v29 = vld [vmem:[%s7505_s2 + $0x52c] ss:$16 sps:$4 sm:$0xff]  }
  0x87   :  { %1479 = vmatpush1.bf16.msra.mxu0 %v5113_v32  ;;  %v5203_v32 = vld [vmem:[%s7505_s2 + $0x608] ss:$16 sps:$4 sm:$0xff]  }
  0x88   :  { %1464 = vmatpush2.bf16.msra.mxu1 %v5110_v31  ;;  %1480 = vmatprep.subr.bf16.mxu0 %v5121_v34  ;;  %v5200_v31 = vld [vmem:[%s7505_s2 + $0x528] ss:$16 sps:$4 sm:$0xff]   ;;  %v5211_v34 = vld [vmem:[%s7507_s4 + $0x74] ss:$8 sps:$4 sm:$0xff]  }
  0x89   :  { %1519 = vmatprep.subr.bf16.mxu1 %v5118_v33  ;;  %v5208_v33 = vld [vmem:[%s7505_s2 + $0x50c] ss:$16 sps:$4 sm:$0xff]  }
  0x8b   :  { %1466 = vmatmul.mubr.bf16.vlgmr.msra.gmra.mxu1 %v5994_v12  ;;  %1481 = vmatpush1.bf16.msra.mxu0 %v5119_v36  ;;  %v5133_v12 = vld [vmem:[%s7505_s2 + $0x26c] ss:$16 sps:$4 sm:$0xff]   ;;  %v5209_v36 = vld [vmem:[%s7507_s4 + $0x70] ss:$8 sps:$4 sm:$0xff]  }
  0x8c   :  { %1520 = vmatpush1.bf16.msra.mxu1 %v5116_v35  ;;  %1482 = vmatprep.subr.bf16.mxu0 %v5127_v54  ;;  %v5206_v35 = vld [vmem:[%s7505_s2 + $0x508] ss:$16 sps:$4 sm:$0xff]   ;;  %v5217_v54 = vld [vmem:[%s7507_s4 + $0x54] ss:$8 sps:$4 sm:$0xff]  }
  0x8d   :  { %1521 = vmatprep.subr.bf16.mxu1 %v5124_v37  ;;  %1551 = vmatprep.mubr.bf16.mxu1 %v6090_v44  ;;  %v5139_v44 = vld [vmem:[%s7505_s2 + $0x24c] ss:$16 sps:$4 sm:$0xff]  }
  0x8e   :  { %v5214_v37 = vld [vmem:[%s7507_s4 + $0x64] ss:$8 sps:$4 sm:$0xff]  }
  0x8f   :  { %1483 = vmatpush1.bf16.msra.mxu0 %v5125_v39  ;;  %v5259_v39 = vld [vmem:[%s7507_s4 + $0x174] ss:$8 sps:$4 sm:$0xff]  }
  0x90   :  { %1522 = vmatpush1.bf16.msra.mxu1 %v5122_v38  ;;  %1484 = vmatprep.subr.bf16.mxu0 %v5133_v12  ;;  %v5215_v38 = vld [vmem:[%s7507_s4 + $0x50] ss:$8 sps:$4 sm:$0xff]   ;;  %v5262_v12 = vld [vmem:[%s7507_s4 + $0x164] ss:$8 sps:$4 sm:$0xff]  }
  0x91   :  { %1523 = vmatprep.subr.bf16.mxu1 %v5130_v40  ;;  %v5218_v40 = vld [vmem:[%s7507_s4 + $0x40] ss:$8 sps:$4 sm:$0xff]  }
  0x93   :  { %1485 = vmatpush1.bf16.msra.mxu0 %v5131_v42  ;;  %v5260_v42 = vld [vmem:[%s7507_s4 + $0x160] ss:$8 sps:$4 sm:$0xff]  }
  0x94   :  { %1524 = vmatpush1.bf16.msra.mxu1 %v5128_v41  ;;  %1486 = vmatprep.subr.bf16.mxu0 %v5139_v44  ;;  %v5223_v41 = vld [vmem:[%s7507_s4 + $0x34] ss:$8 sps:$4 sm:$0xff]   ;;  %v5221_v44 = vld [vmem:[%s7507_s4 + $0x30] ss:$8 sps:$4 sm:$0xff]  }
  0x95   :  { %1525 = vmatprep.subr.bf16.mxu1 %v5136_v43  ;;  %v5265_v43 = vld [vmem:[%s7507_s4 + $0x154] ss:$8 sps:$4 sm:$0xff]  }
  0x97   :  { %1487 = vmatpush1.bf16.msra.mxu0 %v5137_v46  ;;  %v5263_v46 = vld [vmem:[%s7507_s4 + $0x150] ss:$8 sps:$4 sm:$0xff]  }
  0x98   :  { %1526 = vmatpush1.bf16.msra.mxu1 %v5134_v45  ;;  %1488 = vmatprep.subr.bf16.mxu0 %v5145_v48  ;;  %v5226_v45 = vld [vmem:[%s7507_s4 + $0x24] ss:$8 sps:$4 sm:$0xff]   ;;  %v5224_v48 = vld [vmem:[%s7507_s4 + $0x20] ss:$8 sps:$4 sm:$0xff]  }
  0x99   :  { %1527 = vmatprep.subr.bf16.mxu1 %v5142_v47  ;;  %v5268_v47 = vld [vmem:[%s7507_s4 + $0x144] ss:$8 sps:$4 sm:$0xff]  }
  0x9b   :  { %1489 = vmatpush1.bf16.msra.mxu0 %v5143_v50  ;;  %v5266_v50 = vld [vmem:[%s7507_s4 + $0x140] ss:$8 sps:$4 sm:$0xff]  }
  0x9c   :  { %1528 = vmatpush1.bf16.msra.mxu1 %v5140_v49  ;;  %1490 = vmatprep.subr.bf16.mxu0 %v5151_v52  ;;  %v5229_v49 = vld [vmem:[%s7507_s4 + $0x14] ss:$8 sps:$4 sm:$0xff]   ;;  %v5227_v52 = vld [vmem:[%s7507_s4 + $0x10] ss:$8 sps:$4 sm:$0xff]  }
  0x9d   :  { %1529 = vmatprep.subr.bf16.mxu1 %v5148_v51  ;;  %v5271_v51 = vld [vmem:[%s7507_s4 + $0x134] ss:$8 sps:$4 sm:$0xff]  }
  0x9f   :  { %1491 = vmatpush1.bf16.msra.mxu0 %v5149_v55  ;;  %v5269_v55 = vld [vmem:[%s7507_s4 + $0x130] ss:$8 sps:$4 sm:$0xff]  }
  0xa0   :  { %1530 = vmatpush1.bf16.msra.mxu1 %v5146_v53  ;;  %1492 = vmatprep.subr.bf16.mxu0 %v5157_v57  ;;  %v5232_v53 = vld [vmem:[%s7507_s4 + $0x4] ss:$8 sps:$4 sm:$0xff]   ;;  %v5230_v57 = vld [vmem:[%s7507_s4] ss:$8 sps:$4 sm:$0xff]  }
  0xa1   :  { %1531 = vmatprep.subr.bf16.mxu1 %v5154_v56  ;;  %v5274_v56 = vld [vmem:[%s7507_s4 + $0x124] ss:$8 sps:$4 sm:$0xff]  }
  0xa3   :  { %1493 = vmatpush2.bf16.msra.mxu0 %v5155_v59  ;;  %v5272_v59 = vld [vmem:[%s7507_s4 + $0x120] ss:$8 sps:$4 sm:$0xff]  }
  0xa4   :  { %1532 = vmatpush1.bf16.msra.mxu1 %v5152_v58  ;;  %1494 = vmatprep.subr.bf16.mxu0 %v5163_v61  ;;  %v5235_v58 = vld [vmem:[%s7507_s4 + $0xf4] ss:$8 sps:$4 sm:$0xff]   ;;  %v5233_v61 = vld [vmem:[%s7507_s4 + $0xf0] ss:$8 sps:$4 sm:$0xff]  }
  0xa5   :  { %1533 = vmatprep.subr.bf16.mxu1 %v5160_v60  ;;  %v5277_v60 = vld [vmem:[%s7507_s4 + $0x114] ss:$8 sps:$4 sm:$0xff]  }
  0xa7   :  { %1495 = vmatpush2.bf16.msra.mxu0 %v5161_v63  ;;  %v5275_v63 = vld [vmem:[%s7507_s4 + $0x110] ss:$8 sps:$4 sm:$0xff]  }
  0xa8   :  { %1534 = vmatpush1.bf16.msra.mxu1 %v5158_v62  ;;  %1496 = vmatprep.subr.bf16.mxu0 %v5169_v1  ;;  %v5238_v62 = vld [vmem:[%s7507_s4 + $0xe4] ss:$8 sps:$4 sm:$0xff]   ;;  %v5236_v1 = vld [vmem:[%s7507_s4 + $0xe0] ss:$8 sps:$4 sm:$0xff]  }
  0xa9   :  { %1535 = vmatprep.subr.bf16.mxu1 %v5166_v0  ;;  %v5280_v0 = vld [vmem:[%s7507_s4 + $0x104] ss:$8 sps:$4 sm:$0xff]  }
  0xab   :  { %1497 = vmatpush2.bf16.msra.mxu0 %v5167_v3  ;;  %v5278_v3 = vld [vmem:[%s7507_s4 + $0x100] ss:$8 sps:$4 sm:$0xff]  }
  0xac   :  { %1536 = vmatpush2.bf16.msra.mxu1 %v5164_v2  ;;  %1498 = vmatprep.subr.bf16.mxu0 %v5175_v5  ;;  %v5241_v2 = vld [vmem:[%s7507_s4 + $0xd4] ss:$8 sps:$4 sm:$0xff]   ;;  %v5239_v5 = vld [vmem:[%s7507_s4 + $0xd0] ss:$8 sps:$4 sm:$0xff]  }
  0xad   :  { %1537 = vmatprep.subr.bf16.mxu1 %v5172_v4  ;;  %v5283_v4 = vld [vmem:[%s7507_s4 + $0x1f4] ss:$8 sps:$4 sm:$0xff]  }
  0xaf   :  { %1499 = vmatpush2.bf16.msra.mxu0 %v5173_v7  ;;  %v5281_v7 = vld [vmem:[%s7507_s4 + $0x1f0] ss:$8 sps:$4 sm:$0xff]  }
  0xb0   :  { %1538 = vmatpush2.bf16.msra.mxu1 %v5170_v6  ;;  %1500 = vmatprep.subr.bf16.mxu0 %v5181_v9  ;;  %v5244_v6 = vld [vmem:[%s7507_s4 + $0xc4] ss:$8 sps:$4 sm:$0xff]   ;;  %v5242_v9 = vld [vmem:[%s7507_s4 + $0xc0] ss:$8 sps:$4 sm:$0xff]  }
  0xb1   :  { %1539 = vmatprep.subr.bf16.mxu1 %v5178_v8  ;;  %v5286_v8 = vld [vmem:[%s7507_s4 + $0x1e4] ss:$8 sps:$4 sm:$0xff]  }
  0xb3   :  { %1501 = vmatpush2.bf16.msra.mxu0 %v5179_v11  ;;  %v5284_v11 = vld [vmem:[%s7507_s4 + $0x1e0] ss:$8 sps:$4 sm:$0xff]  }
  0xb4   :  { %1540 = vmatpush2.bf16.msra.mxu1 %v5176_v10  ;;  %1502 = vmatprep.subr.bf16.mxu0 %v5187_v15  ;;  %v5247_v10 = vld [vmem:[%s7507_s4 + $0xb4] ss:$8 sps:$4 sm:$0xff]   ;;  %v5245_v15 = vld [vmem:[%s7507_s4 + $0xb0] ss:$8 sps:$4 sm:$0xff]  }
  0xb5   :  { %1541 = vmatprep.subr.bf16.mxu1 %v5184_v14  ;;  %v5289_v14 = vld [vmem:[%s7507_s4 + $0x1d4] ss:$8 sps:$4 sm:$0xff]  }
  0xb7   :  { %1503 = vmatpush2.bf16.msra.mxu0 %v5185_v17  ;;  %v5287_v17 = vld [vmem:[%s7507_s4 + $0x1d0] ss:$8 sps:$4 sm:$0xff]  }
  0xb8   :  { %1542 = vmatpush2.bf16.msra.mxu1 %v5182_v16  ;;  %1504 = vmatprep.subr.bf16.mxu0 %v5193_v19  ;;  %v5250_v16 = vld [vmem:[%s7507_s4 + $0xa4] ss:$8 sps:$4 sm:$0xff]   ;;  %v5253_v19 = vld [vmem:[%s7507_s4 + $0x94] ss:$8 sps:$4 sm:$0xff]  }
  0xb9   :  { %1543 = vmatprep.subr.bf16.mxu1 %v5190_v18  ;;  %v5248_v18 = vld [vmem:[%s7507_s4 + $0xa0] ss:$8 sps:$4 sm:$0xff]  }
  0xbb   :  { %1505 = vmatpush2.bf16.msra.mxu0 %v5191_v22  ;;  %v5256_v22 = vld [vmem:[%s7507_s4 + $0x84] ss:$8 sps:$4 sm:$0xff]  }
  0xbc   :  { %1544 = vmatpush2.bf16.msra.mxu1 %v5188_v20  ;;  %1506 = vmatprep.subr.bf16.mxu0 %v5199_v25  ;;  %v5251_v20 = vld [vmem:[%s7507_s4 + $0x90] ss:$8 sps:$4 sm:$0xff]   ;;  %v5292_v25 = vld [vmem:[%s7507_s4 + $0x1c4] ss:$8 sps:$4 sm:$0xff]  }
  0xbd   :  { %1545 = vmatprep.subr.bf16.mxu1 %v5196_v24  ;;  %v5254_v24 = vld [vmem:[%s7507_s4 + $0x80] ss:$8 sps:$4 sm:$0xff]  }
  0xbf   :  { %1507 = vmatpush2.bf16.msra.mxu0 %v5197_v28  ;;  %v5295_v28 = vld [vmem:[%s7507_s4 + $0x1b4] ss:$8 sps:$4 sm:$0xff]  }
  0xc0   :  { %1546 = vmatpush2.bf16.msra.mxu1 %v5194_v27  ;;  %1576 = vmatprep.subr.bf16.mxu0 %v5205_v30  ;;  %v5290_v27 = vld [vmem:[%s7507_s4 + $0x1c0] ss:$8 sps:$4 sm:$0xff]   ;;  %v5298_v30 = vld [vmem:[%s7507_s4 + $0x1a4] ss:$8 sps:$4 sm:$0xff]  }
  0xc1   :  { %1547 = vmatprep.subr.bf16.mxu1 %v5202_v29  ;;  %v5293_v29 = vld [vmem:[%s7507_s4 + $0x1b0] ss:$8 sps:$4 sm:$0xff]  }
  0xc2   :  { %1509 = vmatmul.mubr.bf16.vlgmr.msra.gmra.mxu0 %v5996_v13  ;;  %v5212_v13 = vld [vmem:[%s7507_s4 + $0x60] ss:$8 sps:$4 sm:$0xff]  }
  0xc3   :  { %1577 = vmatpush1.bf16.msra.mxu0 %v5203_v32  ;;  %1594 = vmatprep.mubr.bf16.mxu0 %v5705_v21  ;;  %v5301_v32 = vld [vmem:[%s7507_s4 + $0x194] ss:$8 sps:$4 sm:$0xff]  }
  0xc4   :  { %1548 = vmatpush2.bf16.msra.mxu1 %v5200_v31  ;;  %2013 = vmatprep.subr.bf16.mxu0 %v5211_v34  ;;  %v5296_v31 = vld [vmem:[%s7507_s4 + $0x1a0] ss:$8 sps:$4 sm:$0xff]   ;;  %v5304_v34 = vld [vmem:[%s7507_s4 + $0x184] ss:$8 sps:$4 sm:$0xff]  }
  0xc5   :  { %1549 = vmatprep.subr.bf16.mxu1 %v5208_v33  ;;  %v5299_v33 = vld [vmem:[%s7507_s4 + $0x190] ss:$8 sps:$4 sm:$0xff]  }
  0xc8   :  { %1550 = vmatpush2.bf16.msra.mxu1 %v5206_v35  ;;  %v5302_v35 = vld [vmem:[%s7507_s4 + $0x180] ss:$8 sps:$4 sm:$0xff]  }
  0xc9   :  { %2056 = vmatprep.subr.bf16.mxu1 %v5259_v39 }
  0xca   :  { %4529 = vmatmul.mubr.msk.bf16.vlgmr.msra.gmra.mxu0 %vm1257_vm0, %v6025_v23  ;;  %v5220_v23 = vld [vmem:[%s7507_s4 + $0x44] ss:$8 sps:$4 sm:$0xff]  }
  0xcb   :  { %1552 = vmatmul.mubr.bf16.vlgmr.msra.gmra.mxu1 %v6213_v26  ;;  %2014 = vmatpush1.bf16.msra.mxu0 %v5209_v36  ;;  %v5257_v26 = vld [vmem:[%s7507_s4 + $0x170] ss:$8 sps:$4 sm:$0xff]  }
  0xcc   :  { %2015 = vmatprep.subr.bf16.mxu0 %v5214_v37  ;;  %2057 = vmatpush1.bf16.msra.mxu1 %v5257_v26  ;;  %v257_v37 = vlaneseq }
  0xcd   :  { %2058 = vmatprep.subr.bf16.mxu1 %v5262_v12  ;;  %v255_v12 = vld [vmem:[%s7508_s3] sm:$0xf] }
  0xcf   :  { %2016 = vmatpush1.bf16.msra.mxu0 %v5212_v13 }
  0xd0   :  { %2017 = vmatprep.subr.bf16.mxu0 %v5217_v54  ;;  %2059 = vmatpush1.bf16.msra.mxu1 %v5260_v42  ;;  %v6620_v54 = vshrl.u32 %v257_v37, 7 }
  0xd1   :  { %2060 = vmatprep.subr.bf16.mxu1 %v5265_v43 }
  0xd2   :  { %v6623_v26 = vsub.s32 1, %v6620_v54  ;;  %v6626_v39 = vsub.s32 0, %v6620_v54 }
  0xd3   :  { %2018 = vmatpush1.bf16.msra.mxu0 %v5215_v38 }
  0xd4   :  { %2019 = vmatprep.subr.bf16.mxu0 %v5220_v23  ;;  %2061 = vmatpush1.bf16.msra.mxu1 %v5263_v46  ;;  %v264_v42 = vrot.slane %v255_v12, %v6623_v26  ;;  %v260_v43 = vrot.slane %v255_v12, %v6626_v39 }
  0xd5   :  { %2062 = vmatprep.subr.bf16.mxu1 %v5268_v47 }
  0xd7   :  { %2020 = vmatpush1.bf16.msra.mxu0 %v5218_v40 }
  0xd8   :  { %2021 = vmatprep.subr.bf16.mxu0 %v5223_v41  ;;  %2063 = vmatpush1.bf16.msra.mxu1 %v5266_v50 }
  0xd9   :  { %2064 = vmatprep.subr.bf16.mxu1 %v5271_v51 }
  0xdb   :  { %2022 = vmatpush1.bf16.msra.mxu0 %v5221_v44 }
  0xdc   :  { %2023 = vmatprep.subr.bf16.mxu0 %v5226_v45  ;;  %2065 = vmatpush1.bf16.msra.mxu1 %v5269_v55 }
  0xdd   :  { %2066 = vmatprep.subr.bf16.mxu1 %v5274_v56 }
  0xdf   :  { %2024 = vmatpush1.bf16.msra.mxu0 %v5224_v48 }
  0xe0   :  { %2025 = vmatprep.subr.bf16.mxu0 %v5229_v49  ;;  %2067 = vmatpush1.bf16.msra.mxu1 %v5272_v59 }
  0xe1   :  { %2068 = vmatprep.subr.bf16.mxu1 %v5277_v60 }
  0xe3   :  { %2026 = vmatpush1.bf16.msra.mxu0 %v5227_v52 }
  0xe4   :  { %2027 = vmatprep.subr.bf16.mxu0 %v5232_v53  ;;  %2069 = vmatpush1.bf16.msra.mxu1 %v5275_v63 }
  0xe5   :  { %2070 = vmatprep.subr.bf16.mxu1 %v5280_v0 }
  0xe7   :  { %2028 = vmatpush1.bf16.msra.mxu0 %v5230_v57 }
  0xe8   :  { %2029 = vmatprep.subr.bf16.mxu0 %v5235_v58  ;;  %2071 = vmatpush1.bf16.msra.mxu1 %v5278_v3 }
  0xe9   :  { %2072 = vmatprep.subr.bf16.mxu1 %v5283_v4 }
  0xeb   :  { %2030 = vmatpush2.bf16.msra.mxu0 %v5233_v61 }
  0xec   :  { %2031 = vmatprep.subr.bf16.mxu0 %v5238_v62  ;;  %2073 = vmatpush2.bf16.msra.mxu1 %v5281_v7 }
  0xed   :  { %2074 = vmatprep.subr.bf16.mxu1 %v5286_v8 }
  0xef   :  { %2032 = vmatpush2.bf16.msra.mxu0 %v5236_v1 }
  0xf0   :  { %2033 = vmatprep.subr.bf16.mxu0 %v5241_v2  ;;  %2075 = vmatpush2.bf16.msra.mxu1 %v5284_v11 }
  0xf1   :  { %2076 = vmatprep.subr.bf16.mxu1 %v5289_v14 }
  0xf3   :  { %2034 = vmatpush2.bf16.msra.mxu0 %v5239_v5 }
  0xf4   :  { %2035 = vmatprep.subr.bf16.mxu0 %v5244_v6  ;;  %2077 = vmatpush2.bf16.msra.mxu1 %v5287_v17  ;;  %v6635_v17 = vsub.s32 3, %v6620_v54 }
  0xf5   :  { %2078 = vmatprep.subr.bf16.mxu1 %v5292_v25 }
  0xf7   :  { %2036 = vmatpush2.bf16.msra.mxu0 %v5242_v9 }
  0xf8   :  { %2037 = vmatprep.subr.bf16.mxu0 %v5247_v10  ;;  %2079 = vmatpush2.bf16.msra.mxu1 %v5290_v27 }
  0xf9   :  { %2080 = vmatprep.subr.bf16.mxu1 %v5295_v28 }
  0xfb   :  { %2038 = vmatpush2.bf16.msra.mxu0 %v5245_v15 }
  0xfc   :  { %2039 = vmatprep.subr.bf16.mxu0 %v5250_v16  ;;  %2081 = vmatpush2.bf16.msra.mxu1 %v5293_v29 }
  0xfd   :  { %2082 = vmatprep.subr.bf16.mxu1 %v5298_v30 }
  0xff   :  { %2040 = vmatpush2.bf16.msra.mxu0 %v5248_v18  ;;  %v6638_v18 = vsub.s32 2, %v6620_v54 }
 0x100   :  { %2041 = vmatprep.subr.bf16.mxu0 %v5253_v19  ;;  %2083 = vmatpush2.bf16.msra.mxu1 %v5296_v31 }
 0x101   :  { %2084 = vmatprep.subr.bf16.mxu1 %v5301_v32  ;;  %v268_v25 = vrot.slane %v255_v12, %v6638_v18 }
 0x102   :  { %v1295_v38 = vpop.f32.mrf.mxu0 }
 0x103   :  { %2042 = vmatpush2.bf16.msra.mxu0 %v5251_v20  ;;  %v1338_v36 = vpop.f32.mrf.mxu1  ;;  %v1296_v47 = vadd.f32 %v1295_v38, %v260_v43 }
 0x104   :  { %2043 = vmatprep.subr.bf16.mxu0 %v5256_v22  ;;  %2085 = vmatpush2.bf16.msra.mxu1 %v5299_v33  ;;  %v1297_v40 = vpop.f32.mrf.mxu0 }
 0x105   :  { %2086 = vmatprep.subr.bf16.mxu1 %v5304_v34  ;;  %v1340_v13 = vpop.f32.mrf.mxu1  ;;  %v1298_v46 = vadd.f32 %v1297_v40, %v264_v42  ;;  %v1339_v55 = vadd.f32 %v1338_v36, %v1296_v47 }
 0x106   :  { %v1299_v44 = vpop.f32.mrf.mxu0 }
 0x107   :  { %2044 = vmatpush2.bf16.msra.mxu0 %v5254_v24  ;;  %v1342_v23 = vpop.f32.mrf.mxu1  ;;  %v1300_v49 = vadd.f32 %v1299_v44, %v260_v43  ;;  %v1341_v52 = vadd.f32 %v1340_v13, %v1298_v46  ;;  %v272_v24 = vrot.slane %v255_v12, %v6635_v17 }
 0x108   :  { %2087 = vmatpush2.bf16.msra.mxu1 %v5302_v35  ;;  %v1301_v48 = vpop.f32.mrf.mxu0 }
 0x109   :  { %v1344_v41 = vpop.f32.mrf.mxu1  ;;  %v1302_v53 = vadd.f32 %v1301_v48, %v264_v42  ;;  %v1343_v57 = vadd.f32 %v1342_v23, %v1300_v49 }
 0x10b   :  { %v1424_v45 = vpop.f32.mrf.mxu1  ;;  %v1345_v62 = vadd.f32 %v1344_v41, %v1302_v53 }
 0x10d   :  { %v1426_v50 = vpop.f32.mrf.mxu1 }
 0x10f   :  { %v1428_v59 = vpop.f32.mrf.mxu1 }
 0x111   :  { %v1430_v4 = vpop.f32.mrf.mxu1 }
 0x142   :  { %v1381_v51 = vpop.f32.mrf.mxu0 }
 0x143   :  { %v1382_v60 = vadd.f32 %v1381_v51, %v1339_v55 }
 0x144   :  { %v1383_v56 = vpop.f32.mrf.mxu0 }
 0x145   :  { %v1384_v58 = vadd.f32 %v1383_v56, %v1341_v52  ;;  %v1425_v5 = vadd.f32 %v1424_v45, %v1382_v60  ;;  %v5305_v60 = vld [vmem:[%s7509_s6 + $0xe0] ss:$16 sps:$4 sm:$0xff]  }
 0x146   :  { %v1385_v61 = vpop.f32.mrf.mxu0 }
 0x147   :  { %v1386_v63 = vadd.f32 %v1385_v61, %v1343_v57  ;;  %v1427_v1 = vadd.f32 %v1426_v50, %v1384_v58  ;;  %v1605_v10 = vmax.f32 %v1425_v5, 0.0  ;;  %v5308_v61 = vld [vmem:[%s7509_s6 + $0xe8] ss:$16 sps:$4 sm:$0xff]  }
 0x148   :  { %v1387_v0 = vpop.f32.mrf.mxu0  ;;  %v5320_v5 = vld [vmem:[%s7509_s6 + $0xa8] ss:$16 sps:$4 sm:$0xff]  }
 0x149   :  { %v1429_v2 = vadd.f32 %v1428_v59, %v1386_v63  ;;  %v1388_v3 = vadd.f32 %v1387_v0, %v1345_v62  ;;  %v1606_v8 = vmax.f32 %v1427_v1, 0.0  ;;  %v5307_v59 = vld [vmem:[%s7509_s6 + $0xe4] ss:$16 sps:$4 sm:$0xff]   ;;  %v5310_v62 = vld [vmem:[%s7509_s6 + $0xec] ss:$16 sps:$4 sm:$0xff]  }
 0x14a   :  { %2328 = vmatprep.subr.bf16.mxu0 %v5307_v59  ;;  %2371 = vmatprep.subr.bf16.mxu1 %v5310_v62  ;;  %v5316_v63 = vld [vmem:[%s7509_s6 + $0xcc] ss:$16 sps:$4 sm:$0xff]   ;;  %v5311_v0 = vld [vmem:[%s7509_s6 + $0xc0] ss:$16 sps:$4 sm:$0xff]   ;;  %v5314_v1 = vld [vmem:[%s7509_s6 + $0xc8] ss:$16 sps:$4 sm:$0xff]  }
 0x14b   :  { %v1431_v6 = vadd.f32 %v1430_v4, %v1388_v3  ;;  %v1609_v7 = vmax.f32 %v1429_v2, 0.0  ;;  %v1467_v15 = vpop.f32.mrf.mxu1  ;;  %v5319_v2 = vld [vmem:[%s7509_s6 + $0xa4] ss:$16 sps:$4 sm:$0xff]   ;;  %v5322_v3 = vld [vmem:[%s7509_s6 + $0xac] ss:$16 sps:$4 sm:$0xff]  }
 0x14c   :  { %v1468_v31 = vadd.f32 %v1467_v15, %v268_v25  ;;  %v5317_v4 = vld [vmem:[%s7509_s6 + $0xa0] ss:$16 sps:$4 sm:$0xff]   ;;  %v5337_v15 = vld [vmem:[%s7509_s6 + $0x44] ss:$16 sps:$4 sm:$0xff]  }
 0x14d   :  { %v1610_v9 = vmax.f32 %v1431_v6, 0.0  ;;  %v1613_v14 = vpack.c.bf16 %v1609_v7, %v1605_v10  ;;  %v1469_v16 = vpop.f32.mrf.mxu1  ;;  %v5325_v6 = vld [vmem:[%s7509_s6 + $0x84] ss:$16 sps:$4 sm:$0xff]   ;;  %v5328_v7 = vld [vmem:[%s7509_s6 + $0x8c] ss:$16 sps:$4 sm:$0xff]  }
 0x14e   :  { %v1470_v30 = vadd.f32 %v1469_v16, %v272_v24  ;;  %v5331_v10 = vld [vmem:[%s7509_s6 + $0x64] ss:$16 sps:$4 sm:$0xff]   ;;  %v5332_v16 = vld [vmem:[%s7509_s6 + $0x68] ss:$16 sps:$4 sm:$0xff]  }
 0x14f   :  { %v1614_v11 = vpack.c.bf16 %v1610_v9, %v1606_v8  ;;  %v1471_v20 = vpop.f32.mrf.mxu1  ;;  %v5323_v8 = vld [vmem:[%s7509_s6 + $0x80] ss:$16 sps:$4 sm:$0xff]   ;;  %v5326_v9 = vld [vmem:[%s7509_s6 + $0x88] ss:$16 sps:$4 sm:$0xff]  }
 0x150   :  { %v1472_v34 = vadd.f32 %v1471_v20, %v268_v25  ;;  %v5335_v20 = vld [vmem:[%s7509_s6 + $0x40] ss:$16 sps:$4 sm:$0xff]   ;;  %v5346_v25 = vld [vmem:[%s7509_s6 + $0x2c] ss:$16 sps:$4 sm:$0xff]  }
 0x151   :  { %2045 = vmatprep.mubr.bf16.mxu0 %v1614_v11  ;;  %v1473_v28 = vpop.f32.mrf.mxu1  ;;  %v5329_v11 = vld [vmem:[%s7509_s6 + $0x60] ss:$16 sps:$4 sm:$0xff]  }
 0x152   :  { %2046 = vmatmul.mubr.bf16.vlgmr.msra.gmra.mxu0 %v1613_v14  ;;  %v1474_v38 = vadd.f32 %v1473_v28, %v272_v24  ;;  %v5334_v14 = vld [vmem:[%s7509_s6 + $0x6c] ss:$16 sps:$4 sm:$0xff]   ;;  %v5338_v24 = vld [vmem:[%s7509_s6 + $0x48] ss:$16 sps:$4 sm:$0xff]   ;;  %v5349_v28 = vld [vmem:[%s7509_s6 + $0x4] ss:$16 sps:$4 sm:$0xff]  }
 0x153   :  { %2360 = vmatprep.mubr.bf16.mxu0 %v5705_v21  ;;  %2329 = vmatpush1.bf16.msra.mxu0 %v5305_v60 }
 0x182   :  { %v1510_v19 = vpop.f32.mrf.mxu0 }
 0x183   :  { %v1511_v36 = vadd.f32 %v1510_v19, %v1468_v31  ;;  %v5340_v19 = vld [vmem:[%s7509_s6 + $0x4c] ss:$16 sps:$4 sm:$0xff]   ;;  %v5347_v31 = vld [vmem:[%s7509_s6] ss:$16 sps:$4 sm:$0xff]  }
 0x184   :  { %v1512_v22 = vpop.f32.mrf.mxu0 }
 0x185   :  { %v1513_v35 = vadd.f32 %v1512_v22, %v1470_v30  ;;  %v5343_v22 = vld [vmem:[%s7509_s6 + $0x24] ss:$16 sps:$4 sm:$0xff]   ;;  %v5352_v30 = vld [vmem:[%s7509_s6 + $0xc] ss:$16 sps:$4 sm:$0xff]  }
 0x186   :  { %v1514_v27 = vpop.f32.mrf.mxu0 }
 0x187   :  { %v1515_v23 = vadd.f32 %v1514_v27, %v1472_v34  ;;  %v5341_v27 = vld [vmem:[%s7509_s6 + $0x20] ss:$16 sps:$4 sm:$0xff]   ;;  %v5358_v34 = vld [vmem:[%s7510_s8 + $0x50c] ss:$28 sps:$4 sm:$0xff]  }
 0x188   :  { %v1516_v29 = vpop.f32.mrf.mxu0 }
 0x189   :  { %v1517_v44 = vadd.f32 %v1516_v29, %v1474_v38  ;;  %v5344_v29 = vld [vmem:[%s7509_s6 + $0x28] ss:$16 sps:$4 sm:$0xff]  }
 0x18a   :  { %v1596_v33 = vpop.f32.mrf.mxu0 }
 0x18b   :  { %v1553_v32 = vpop.f32.mrf.mxu1 }
 0x18c   :  { %v1598_v13 = vpop.f32.mrf.mxu0  ;;  %v1554_v41 = vadd.f32 %v1553_v32, %v1511_v36  ;;  %v5350_v32 = vld [vmem:[%s7509_s6 + $0x8] ss:$16 sps:$4 sm:$0xff]  }
 0x18d   :  { %v1555_v37 = vpop.f32.mrf.mxu1 }
 0x18e   :  { %v1556_v40 = vadd.f32 %v1555_v37, %v1513_v35  ;;  %v1600_v43 = vpop.f32.mrf.mxu0  ;;  %v1597_v50 = vadd.f32 %v1596_v33, %v1554_v41  ;;  %v5355_v33 = vld [vmem:[%s7510_s8 + $0x18c] ss:$28 sps:$4 sm:$0xff]   ;;  %v1681_v35 = vld [vmem:[%s7511_s5] sm:$0x3] }
 0x18f   :  { %v1557_v42 = vpop.f32.mrf.mxu1  ;;  %v1690_v38 = vrot.slane %v1681_v35, %v6623_v26 }
 0x190   :  { %v1558_v12 = vadd.f32 %v1557_v42, %v1515_v23  ;;  %v1602_v46 = vpop.f32.mrf.mxu0  ;;  %v1599_v47 = vadd.f32 %v1598_v13, %v1556_v40  ;;  %v1607_v56 = vmax.f32 %v1597_v50, 0.0  ;;  %v1686_v13 = vrot.slane %v1681_v35, %v6626_v39  ;;  %v5397_v35 = vld [vmem:[%s7510_s8 + $0x4] ss:$28 sps:$4 sm:$0xff]  }
 0x191   :  { %v1559_v45 = vpop.f32.mrf.mxu1 }
 0x192   :  { %v1601_v48 = vadd.f32 %v1600_v43, %v1558_v12  ;;  %v1560_v49 = vadd.f32 %v1559_v45, %v1517_v44  ;;  %v1608_v53 = vmax.f32 %v1599_v47, 0.0 }
 0x194   :  { %v1603_v51 = vadd.f32 %v1602_v46, %v1560_v49  ;;  %v1611_v52 = vmax.f32 %v1601_v48, 0.0 }
 0x196   :  { %v1612_v55 = vmax.f32 %v1603_v51, 0.0  ;;  %v1615_v58 = vpack.c.bf16 %v1611_v52, %v1607_v56 }
 0x198   :  { %v1616_v57 = vpack.c.bf16 %v1612_v55, %v1608_v53 }
 0x19a   :  { %2088 = vmatprep.mubr.bf16.mxu1 %v1616_v57  ;;  %v4867_v57 = vld [vmem:[%s7513_s1] sm:$0xff]  }
 0x19b   :  { %2089 = vmatmul.mubr.bf16.vlgmr.msra.gmra.mxu1 %v1615_v58  ;;  %v4868_v58 = vunpack.c.l.bf16 %v4867_v57  ;;  %v4869_v60 = vunpack.c.h.bf16 %v4867_v57  ;;  %v5428_v57 = vld [vmem:[%s7510_s8 + $0x5e8] ss:$28 sps:$4 sm:$0xff]  }
 0x19c   :  { %2403 = vmatprep.mubr.bf16.mxu1 %v5705_v21  ;;  %v5313_v21 = vld [vmem:[%s7509_s6 + $0xc4] ss:$16 sps:$4 sm:$0xff]   ;;  %2372 = vmatpush1.bf16.msra.mxu1 %v5308_v61 }
 0x19d   :  { %2330 = vmatprep.subr.bf16.mxu0 %v5313_v21  ;;  %2373 = vmatprep.subr.bf16.mxu1 %v5316_v63 }
 0x19e   :  { %2331 = vmatpush1.bf16.msra.mxu0 %v5311_v0 }
 0x19f   :  { %2332 = vmatprep.subr.bf16.mxu0 %v5319_v2  ;;  %v5356_v2 = vld [vmem:[%s7510_s8 + $0x508] ss:$28 sps:$4 sm:$0xff]  }
 0x1a0   :  { %2374 = vmatpush1.bf16.msra.mxu1 %v5314_v1  ;;  %v5353_v1 = vld [vmem:[%s7510_s8 + $0x188] ss:$28 sps:$4 sm:$0xff]  }
 0x1a1   :  { %2375 = vmatprep.subr.bf16.mxu1 %v5322_v3 }
 0x1a2   :  { %2333 = vmatpush1.bf16.msra.mxu0 %v5317_v4  ;;  %v5361_v4 = vld [vmem:[%s7510_s8 + $0x154] ss:$28 sps:$4 sm:$0xff]  }
 0x1a3   :  { %2334 = vmatprep.subr.bf16.mxu0 %v5325_v6  ;;  %v5359_v6 = vld [vmem:[%s7510_s8 + $0x150] ss:$28 sps:$4 sm:$0xff]  }
 0x1a4   :  { %2376 = vmatpush1.bf16.msra.mxu1 %v5320_v5  ;;  %v5364_v5 = vld [vmem:[%s7510_s8 + $0x4d4] ss:$28 sps:$4 sm:$0xff]  }
 0x1a5   :  { %2377 = vmatprep.subr.bf16.mxu1 %v5328_v7  ;;  %v5362_v7 = vld [vmem:[%s7510_s8 + $0x4d0] ss:$28 sps:$4 sm:$0xff]  }
 0x1a6   :  { %2335 = vmatpush1.bf16.msra.mxu0 %v5323_v8  ;;  %v5367_v8 = vld [vmem:[%s7510_s8 + $0x11c] ss:$28 sps:$4 sm:$0xff]  }
 0x1a7   :  { %2336 = vmatprep.subr.bf16.mxu0 %v5331_v10  ;;  %v5365_v10 = vld [vmem:[%s7510_s8 + $0x118] ss:$28 sps:$4 sm:$0xff]  }
 0x1a8   :  { %2378 = vmatpush1.bf16.msra.mxu1 %v5326_v9  ;;  %v5370_v9 = vld [vmem:[%s7510_s8 + $0x49c] ss:$28 sps:$4 sm:$0xff]  }
 0x1a9   :  { %2379 = vmatprep.subr.bf16.mxu1 %v5334_v14  ;;  %v5373_v14 = vld [vmem:[%s7510_s8 + $0xe4] ss:$28 sps:$4 sm:$0xff]  }
 0x1aa   :  { %2337 = vmatpush1.bf16.msra.mxu0 %v5329_v11  ;;  %v5368_v11 = vld [vmem:[%s7510_s8 + $0x498] ss:$28 sps:$4 sm:$0xff]  }
 0x1ab   :  { %2338 = vmatprep.subr.bf16.mxu0 %v5337_v15  ;;  %v5376_v15 = vld [vmem:[%s7510_s8 + $0x464] ss:$28 sps:$4 sm:$0xff]  }
 0x1ac   :  { %2380 = vmatpush1.bf16.msra.mxu1 %v5332_v16  ;;  %v5371_v16 = vld [vmem:[%s7510_s8 + $0xe0] ss:$28 sps:$4 sm:$0xff]  }
 0x1ad   :  { %2381 = vmatprep.subr.bf16.mxu1 %v5340_v19  ;;  %v5374_v19 = vld [vmem:[%s7510_s8 + $0x460] ss:$28 sps:$4 sm:$0xff]  }
 0x1ae   :  { %2339 = vmatpush1.bf16.msra.mxu0 %v5335_v20  ;;  %v5379_v20 = vld [vmem:[%s7510_s8 + $0xac] ss:$28 sps:$4 sm:$0xff]  }
 0x1af   :  { %2340 = vmatprep.subr.bf16.mxu0 %v5343_v22  ;;  %v5382_v22 = vld [vmem:[%s7510_s8 + $0x42c] ss:$28 sps:$4 sm:$0xff]  }
 0x1b0   :  { %2382 = vmatpush1.bf16.msra.mxu1 %v5338_v24  ;;  %v5377_v24 = vld [vmem:[%s7510_s8 + $0xa8] ss:$28 sps:$4 sm:$0xff]  }
 0x1b1   :  { %2383 = vmatprep.subr.bf16.mxu1 %v5346_v25  ;;  %v5380_v25 = vld [vmem:[%s7510_s8 + $0x428] ss:$28 sps:$4 sm:$0xff]  }
 0x1b2   :  { %2341 = vmatpush1.bf16.msra.mxu0 %v5341_v27  ;;  %v5385_v27 = vld [vmem:[%s7510_s8 + $0x74] ss:$28 sps:$4 sm:$0xff]  }
 0x1b3   :  { %2342 = vmatprep.subr.bf16.mxu0 %v5349_v28  ;;  %v5388_v28 = vld [vmem:[%s7510_s8 + $0x3f4] ss:$28 sps:$4 sm:$0xff]  }
 0x1b4   :  { %2384 = vmatpush1.bf16.msra.mxu1 %v5344_v29  ;;  %v5383_v29 = vld [vmem:[%s7510_s8 + $0x70] ss:$28 sps:$4 sm:$0xff]  }
 0x1b5   :  { %2385 = vmatprep.subr.bf16.mxu1 %v5352_v30  ;;  %v5386_v30 = vld [vmem:[%s7510_s8 + $0x3f0] ss:$28 sps:$4 sm:$0xff]  }
 0x1b6   :  { %2343 = vmatpush1.bf16.msra.mxu0 %v5347_v31  ;;  %v5391_v31 = vld [vmem:[%s7510_s8 + $0x3c] ss:$28 sps:$4 sm:$0xff]  }
 0x1b7   :  { %3871 = vmatprep.subr.bf16.mxu0 %v5355_v33  ;;  %v5389_v33 = vld [vmem:[%s7510_s8 + $0x38] ss:$28 sps:$4 sm:$0xff]  }
 0x1b8   :  { %2386 = vmatpush1.bf16.msra.mxu1 %v5350_v32  ;;  %v5394_v32 = vld [vmem:[%s7510_s8 + $0x3bc] ss:$28 sps:$4 sm:$0xff]  }
 0x1b9   :  { %3914 = vmatprep.subr.bf16.mxu1 %v5358_v34  ;;  %v5392_v34 = vld [vmem:[%s7510_s8 + $0x3b8] ss:$28 sps:$4 sm:$0xff]  }
 0x212   :  { %v2047_v36 = vpop.f32.mrf.mxu0 }
 0x213   :  { %v2048_v40 = vadd.f32 %v2047_v36, %v1686_v13  ;;  %v5400_v36 = vld [vmem:[%s7510_s8 + $0x384] ss:$28 sps:$4 sm:$0xff]  }
 0x214   :  { %v2049_v37 = vpop.f32.mrf.mxu0 }
 0x215   :  { %v2050_v42 = vadd.f32 %v2049_v37, %v1690_v38  ;;  %v5395_v37 = vld [vmem:[%s7510_s8] ss:$28 sps:$4 sm:$0xff]  }
 0x216   :  { %v2051_v23 = vpop.f32.mrf.mxu0 }
 0x217   :  { %v2052_v45 = vadd.f32 %v2051_v23, %v1686_v13  ;;  %v5398_v13 = vld [vmem:[%s7510_s8 + $0x380] ss:$28 sps:$4 sm:$0xff]   ;;  %v5406_v23 = vld [vmem:[%s7510_s8 + $0x6cc] ss:$28 sps:$4 sm:$0xff]  }
 0x218   :  { %v2053_v44 = vpop.f32.mrf.mxu0 }
 0x219   :  { %v2054_v48 = vadd.f32 %v2053_v44, %v1690_v38  ;;  %v5403_v38 = vld [vmem:[%s7510_s8 + $0x34c] ss:$28 sps:$4 sm:$0xff]  }
 0x21a   :  { %v5407_v44 = vld [vmem:[%s7510_s8 + $0x310] ss:$28 sps:$4 sm:$0xff]  }
 0x25b   :  { %v2090_v41 = vpop.f32.mrf.mxu1 }
 0x25c   :  { %v2091_v43 = vadd.f32 %v2090_v41, %v2048_v40  ;;  %v5401_v40 = vld [vmem:[%s7510_s8 + $0x348] ss:$28 sps:$4 sm:$0xff]  }
 0x25d   :  { %v2092_v12 = vpop.f32.mrf.mxu1  ;;  %v5404_v41 = vld [vmem:[%s7510_s8 + $0x6c8] ss:$28 sps:$4 sm:$0xff]  }
 0x25e   :  { %4320 = vst [vmem:[%s7512_s11] sm:$0xff] %v2091_v43  ;;  %v2093_v46 = vadd.f32 %v2092_v12, %v2050_v42  ;;  %v5409_v42 = vld [vmem:[%s7510_s8 + $0x314] ss:$28 sps:$4 sm:$0xff]  }
 0x25f   :  { %v2094_v47 = vpop.f32.mrf.mxu1  ;;  %v5410_v12 = vld [vmem:[%s7510_s8 + $0x690] ss:$28 sps:$4 sm:$0xff]  }
 0x260   :  { %v2103_v49 = vmul.f32 0.5, %v2093_v46  ;;  %4321 = vst [vmem:[%s7512_s11 + $0x8] sm:$0xff] %v2093_v46  ;;  %v2095_v50 = vadd.f32 %v2094_v47, %v2052_v45  ;;  %v5415_v45 = vld [vmem:[%s7510_s8 + $0x2dc] ss:$28 sps:$4 sm:$0xff]  }
 0x261   :  { %v2096_v51 = vpop.f32.mrf.mxu1  ;;  %v5418_v46 = vld [vmem:[%s7510_s8 + $0x65c] ss:$28 sps:$4 sm:$0xff]  }
 0x262   :  { %v2105_v52 = vmul.f32 1.442695, %v2103_v49  ;;  %4322 = vst [vmem:[%s7512_s11 + $0x10] sm:$0xff] %v2095_v50  ;;  %v2097_v53 = vadd.f32 %v2096_v51, %v2054_v48  ;;  %v5413_v47 = vld [vmem:[%s7510_s8 + $0x2d8] ss:$28 sps:$4 sm:$0xff]  }
 0x263   :  { %v5416_v48 = vld [vmem:[%s7510_s8 + $0x658] ss:$28 sps:$4 sm:$0xff]   ;;  %v5421_v49 = vld [vmem:[%s7510_s8 + $0x2a4] ss:$28 sps:$4 sm:$0xff]  }
 0x264   :  { %5673 = vpow2.f32 %v2105_v52  ;;  %v2104_v55 = vmul.f32 0.5, %v2097_v53  ;;  %4323 = vst [vmem:[%s7512_s11 + $0x18] sm:$0xff] %v2097_v53  ;;  %v5419_v51 = vld [vmem:[%s7510_s8 + $0x2a0] ss:$28 sps:$4 sm:$0xff]   ;;  %v5427_v53 = vld [vmem:[%s7510_s8 + $0x26c] ss:$28 sps:$4 sm:$0xff]  }
 0x265   :  { %v5422_v52 = vld [vmem:[%s7510_s8 + $0x620] ss:$28 sps:$4 sm:$0xff]  }
 0x266   :  { %v2107_v56 = vmul.f32 1.442695, %v2104_v55  ;;  %v5430_v55 = vld [vmem:[%s7510_s8 + $0x5ec] ss:$28 sps:$4 sm:$0xff]  }
 0x268   :  { %5675 = vpow2.f32 %v2107_v56  ;;  %v5425_v56 = vld [vmem:[%s7510_s8 + $0x268] ss:$28 sps:$4 sm:$0xff]  }
 0x271   :  { %v5674_v59 = vpop.eup %5673 }
 0x272   :  { %v2109_v61 = vmul.f32 %v5674_v59, %v4868_v58  ;;  %v5433_v58 = vld [vmem:[%s7510_s8 + $0x234] ss:$28 sps:$4 sm:$0xff]  }
 0x273   :  { %v5436_v59 = vld [vmem:[%s7510_s8 + $0x5b4] ss:$28 sps:$4 sm:$0xff]  }
 0x274   :  { %v2111_v63 = vadd.f32 %v2109_v61, %v2091_v43  ;;  %v5412_v43 = vld [vmem:[%s7510_s8 + $0x694] ss:$28 sps:$4 sm:$0xff]  }
 0x275   :  { %v5676_v62 = vpop.eup %5675  ;;  %v5434_v61 = vld [vmem:[%s7510_s8 + $0x5b0] ss:$28 sps:$4 sm:$0xff]  }
 0x276   :  { %v2110_v21 = vmul.f32 %v5676_v62, %v4869_v60  ;;  %v5431_v60 = vld [vmem:[%s7510_s8 + $0x230] ss:$28 sps:$4 sm:$0xff]   ;;  %v5439_v62 = vld [vmem:[%s7510_s8 + $0x1fc] ss:$28 sps:$4 sm:$0xff]  }
 0x278   :  { %v2112_v0 = vadd.f32 %v2110_v21, %v2095_v50  ;;  %v5424_v50 = vld [vmem:[%s7510_s8 + $0x624] ss:$28 sps:$4 sm:$0xff]   ;;  %v5442_v21 = vld [vmem:[%s7510_s8 + $0x57c] ss:$28 sps:$4 sm:$0xff]  }
 0x27a   :  { %v2113_v3 = vpack.c.bf16 %v2112_v0, %v2111_v63  ;;  %v5437_v63 = vld [vmem:[%s7510_s8 + $0x1f8] ss:$28 sps:$4 sm:$0xff]  }
 0x27b   :  { %v5440_v0 = vld [vmem:[%s7510_s8 + $0x578] ss:$28 sps:$4 sm:$0xff]  }
 0x27c   :  { %2361 = vmatmul.mubr.bf16.vlgmr.msra.gmra.mxu0 %v2113_v3  ;;  %2404 = vmatmul.mubr.bf16.vlgmr.msra.gmra.mxu1 %v2113_v3  ;;  %v5443_v3 = vld [vmem:[%s7510_s8 + $0x1c0] ss:$28 sps:$4 sm:$0xff]  }
 0x27d   :  { %3872 = vmatpush1.bf16.msra.mxu0 %v5353_v1  ;;  %3915 = vmatpush1.bf16.msra.mxu1 %v5356_v2  ;;  %v5445_v1 = vld [vmem:[%s7510_s8 + $0x1c4] ss:$28 sps:$4 sm:$0xff]  }
 0x27e   :  { %3873 = vmatprep.subr.bf16.mxu0 %v5361_v4  ;;  %3916 = vmatprep.subr.bf16.mxu1 %v5364_v5  ;;  %v5448_v2 = vld [vmem:[%s7510_s8 + $0x544] ss:$28 sps:$4 sm:$0xff]   ;;  %v5451_v5 = vld [vmem:[%s7510_s8 + $0x194] ss:$28 sps:$4 sm:$0xff]  }
 0x27f   :  { %v5446_v4 = vld [vmem:[%s7510_s8 + $0x540] ss:$28 sps:$4 sm:$0xff]  }
 0x281   :  { %3874 = vmatpush1.bf16.msra.mxu0 %v5359_v6  ;;  %3917 = vmatpush1.bf16.msra.mxu1 %v5362_v7  ;;  %v5454_v6 = vld [vmem:[%s7510_s8 + $0x514] ss:$28 sps:$4 sm:$0xff]   ;;  %v2146_v7 = vld [vmem:[%s7514_s7] sm:$0xf] }
 0x282   :  { %3875 = vmatprep.subr.bf16.mxu0 %v5367_v8  ;;  %3918 = vmatprep.subr.bf16.mxu1 %v5370_v9 }
 0x285   :  { %3876 = vmatpush1.bf16.msra.mxu0 %v5365_v10  ;;  %3919 = vmatpush1.bf16.msra.mxu1 %v5368_v11  ;;  %v2155_v10 = vrot.slane %v2146_v7, %v6623_v26  ;;  %v2163_v11 = vrot.slane %v2146_v7, %v6635_v17 }
 0x286   :  { %3877 = vmatprep.subr.bf16.mxu0 %v5373_v14  ;;  %3920 = vmatprep.subr.bf16.mxu1 %v5376_v15  ;;  %v2151_v14 = vrot.slane %v2146_v7, %v6626_v39  ;;  %v2159_v15 = vrot.slane %v2146_v7, %v6638_v18  ;;  %v5493_v7 = vld [vmem:[%s7510_s8 + $0xc] ss:$28 sps:$4 sm:$0xff]  }
 0x289   :  { %3878 = vmatpush1.bf16.msra.mxu0 %v5371_v16  ;;  %3921 = vmatpush1.bf16.msra.mxu1 %v5374_v19 }
 0x28a   :  { %3879 = vmatprep.subr.bf16.mxu0 %v5379_v20  ;;  %3922 = vmatprep.subr.bf16.mxu1 %v5382_v22 }
 0x28d   :  { %3880 = vmatpush1.bf16.msra.mxu0 %v5377_v24  ;;  %3923 = vmatpush1.bf16.msra.mxu1 %v5380_v25 }
 0x28e   :  { %3881 = vmatprep.subr.bf16.mxu0 %v5385_v27  ;;  %3924 = vmatprep.subr.bf16.mxu1 %v5388_v28 }
 0x291   :  { %3882 = vmatpush1.bf16.msra.mxu0 %v5383_v29  ;;  %3925 = vmatpush1.bf16.msra.mxu1 %v5386_v30 }
 0x292   :  { %3883 = vmatprep.subr.bf16.mxu0 %v5391_v31  ;;  %3926 = vmatprep.subr.bf16.mxu1 %v5394_v32 }
 0x295   :  { %3884 = vmatpush1.bf16.msra.mxu0 %v5389_v33  ;;  %3927 = vmatpush1.bf16.msra.mxu1 %v5392_v34 }
 0x296   :  { %3885 = vmatprep.subr.bf16.mxu0 %v5397_v35  ;;  %3928 = vmatprep.subr.bf16.mxu1 %v5400_v36 }
 0x299   :  { %3886 = vmatpush1.bf16.msra.mxu0 %v5395_v37  ;;  %3929 = vmatpush1.bf16.msra.mxu1 %v5398_v13 }
 0x29a   :  { %3887 = vmatprep.subr.bf16.mxu0 %v5403_v38  ;;  %3930 = vmatprep.subr.bf16.mxu1 %v5406_v23 }
 0x29d   :  { %3888 = vmatpush2.bf16.msra.mxu0 %v5401_v40  ;;  %3931 = vmatpush2.bf16.msra.mxu1 %v5404_v41 }
 0x29e   :  { %3889 = vmatprep.subr.bf16.mxu0 %v5409_v42  ;;  %3932 = vmatprep.subr.bf16.mxu1 %v5412_v43 }
 0x2a1   :  { %3890 = vmatpush2.bf16.msra.mxu0 %v5407_v44  ;;  %3933 = vmatpush2.bf16.msra.mxu1 %v5410_v12  ;;  %v5449_v44 = vld [vmem:[%s7510_s8 + $0x190] ss:$28 sps:$4 sm:$0xff]  }
 0x2a2   :  { %3891 = vmatprep.subr.bf16.mxu0 %v5415_v45  ;;  %3934 = vmatprep.subr.bf16.mxu1 %v5418_v46  ;;  %v5452_v12 = vld [vmem:[%s7510_s8 + $0x510] ss:$28 sps:$4 sm:$0xff]  }
 0x2a5   :  { %3892 = vmatpush2.bf16.msra.mxu0 %v5413_v47  ;;  %3935 = vmatpush2.bf16.msra.mxu1 %v5416_v48  ;;  %v5457_v47 = vld [vmem:[%s7510_s8 + $0x15c] ss:$28 sps:$4 sm:$0xff]  }
 0x2a6   :  { %3893 = vmatprep.subr.bf16.mxu0 %v5421_v49  ;;  %3936 = vmatprep.subr.bf16.mxu1 %v5424_v50  ;;  %v5460_v48 = vld [vmem:[%s7510_s8 + $0x4dc] ss:$28 sps:$4 sm:$0xff]  }
 0x2a7   :  { %v5455_v49 = vld [vmem:[%s7510_s8 + $0x158] ss:$28 sps:$4 sm:$0xff]  }
 0x2a8   :  { %v5458_v50 = vld [vmem:[%s7510_s8 + $0x4d8] ss:$28 sps:$4 sm:$0xff]  }
 0x2a9   :  { %3894 = vmatpush2.bf16.msra.mxu0 %v5419_v51  ;;  %3937 = vmatpush2.bf16.msra.mxu1 %v5422_v52  ;;  %v5463_v51 = vld [vmem:[%s7510_s8 + $0x124] ss:$28 sps:$4 sm:$0xff]  }
 0x2aa   :  { %3895 = vmatprep.subr.bf16.mxu0 %v5427_v53  ;;  %3938 = vmatprep.subr.bf16.mxu1 %v5430_v55  ;;  %v5466_v52 = vld [vmem:[%s7510_s8 + $0x4a4] ss:$28 sps:$4 sm:$0xff]  }
 0x2ab   :  { %v5461_v53 = vld [vmem:[%s7510_s8 + $0x120] ss:$28 sps:$4 sm:$0xff]  }
 0x2ac   :  { %v5464_v55 = vld [vmem:[%s7510_s8 + $0x4a0] ss:$28 sps:$4 sm:$0xff]  }
 0x2ad   :  { %3896 = vmatpush2.bf16.msra.mxu0 %v5425_v56  ;;  %3939 = vmatpush2.bf16.msra.mxu1 %v5428_v57  ;;  %v5469_v56 = vld [vmem:[%s7510_s8 + $0xec] ss:$28 sps:$4 sm:$0xff]  }
 0x2ae   :  { %3897 = vmatprep.subr.bf16.mxu0 %v5433_v58  ;;  %3940 = vmatprep.subr.bf16.mxu1 %v5436_v59  ;;  %v5472_v57 = vld [vmem:[%s7510_s8 + $0x46c] ss:$28 sps:$4 sm:$0xff]  }
 0x2af   :  { %v5467_v58 = vld [vmem:[%s7510_s8 + $0xe8] ss:$28 sps:$4 sm:$0xff]  }
 0x2b0   :  { %v5470_v59 = vld [vmem:[%s7510_s8 + $0x468] ss:$28 sps:$4 sm:$0xff]  }
 0x2b1   :  { %3898 = vmatpush2.bf16.msra.mxu0 %v5431_v60  ;;  %3941 = vmatpush2.bf16.msra.mxu1 %v5434_v61  ;;  %v5475_v60 = vld [vmem:[%s7510_s8 + $0xb4] ss:$28 sps:$4 sm:$0xff]  }
 0x2b2   :  { %3899 = vmatprep.subr.bf16.mxu0 %v5439_v62  ;;  %3942 = vmatprep.subr.bf16.mxu1 %v5442_v21  ;;  %v5478_v61 = vld [vmem:[%s7510_s8 + $0x434] ss:$28 sps:$4 sm:$0xff]  }
 0x2b3   :  { %v5473_v62 = vld [vmem:[%s7510_s8 + $0xb0] ss:$28 sps:$4 sm:$0xff]  }
 0x2b4   :  { %v5476_v21 = vld [vmem:[%s7510_s8 + $0x430] ss:$28 sps:$4 sm:$0xff]  }
 0x2b5   :  { %3900 = vmatpush2.bf16.msra.mxu0 %v5437_v63  ;;  %3943 = vmatpush2.bf16.msra.mxu1 %v5440_v0  ;;  %v5481_v63 = vld [vmem:[%s7510_s8 + $0x7c] ss:$28 sps:$4 sm:$0xff]  }
 0x2b6   :  { %3901 = vmatprep.subr.bf16.mxu0 %v5445_v1  ;;  %3944 = vmatprep.subr.bf16.mxu1 %v5448_v2  ;;  %v5484_v0 = vld [vmem:[%s7510_s8 + $0x3fc] ss:$28 sps:$4 sm:$0xff]  }
 0x2b7   :  { %v5479_v1 = vld [vmem:[%s7510_s8 + $0x78] ss:$28 sps:$4 sm:$0xff]  }
 0x2b8   :  { %v5482_v2 = vld [vmem:[%s7510_s8 + $0x3f8] ss:$28 sps:$4 sm:$0xff]  }
 0x2b9   :  { %3902 = vmatpush2.bf16.msra.mxu0 %v5443_v3  ;;  %3945 = vmatpush2.bf16.msra.mxu1 %v5446_v4  ;;  %v5487_v3 = vld [vmem:[%s7510_s8 + $0x44] ss:$28 sps:$4 sm:$0xff]  }
 0x2ba   :  { %3957 = vmatprep.subr.bf16.mxu0 %v5451_v5  ;;  %4000 = vmatprep.subr.bf16.mxu1 %v5454_v6  ;;  %v5490_v4 = vld [vmem:[%s7510_s8 + $0x3c4] ss:$28 sps:$4 sm:$0xff]  }
 0x2bb   :  { %v5485_v5 = vld [vmem:[%s7510_s8 + $0x40] ss:$28 sps:$4 sm:$0xff]  }
 0x2bc   :  { %v5488_v6 = vld [vmem:[%s7510_s8 + $0x3c0] ss:$28 sps:$4 sm:$0xff]  }
 0x33c   :  { %v2362_v8 = vpop.f32.mrf.mxu0  ;;  %v2405_v9 = vpop.f32.mrf.mxu1 }
 0x33d   :  { %v2363_v29 = vadd.f32 %v2362_v8, %v2151_v14  ;;  %v2406_v30 = vadd.f32 %v2405_v9, %v2159_v15  ;;  %v5496_v8 = vld [vmem:[%s7510_s8 + $0x38c] ss:$28 sps:$4 sm:$0xff]  }
 0x33e   :  { %v2364_v16 = vpop.f32.mrf.mxu0  ;;  %v2407_v19 = vpop.f32.mrf.mxu1  ;;  %v5491_v9 = vld [vmem:[%s7510_s8 + $0x8] ss:$28 sps:$4 sm:$0xff]  }
 0x33f   :  { %v2365_v24 = vadd.f32 %v2364_v16, %v2155_v10  ;;  %v2408_v25 = vadd.f32 %v2407_v19, %v2163_v11  ;;  %v2414_v40 = vmax.f32 %v2363_v29, 0.0  ;;  %v2416_v41 = vmax.f32 %v2406_v30, 0.0  ;;  %v5500_v16 = vld [vmem:[%s7510_s8 + $0x6d0] ss:$28 sps:$4 sm:$0xff]   ;;  %v5505_v19 = vld [vmem:[%s7510_s8 + $0x31c] ss:$28 sps:$4 sm:$0xff]  }
 0x340   :  { %v2366_v20 = vpop.f32.mrf.mxu0  ;;  %v2409_v22 = vpop.f32.mrf.mxu1  ;;  %v5512_v29 = vld [vmem:[%s7510_s8 + $0x660] ss:$28 sps:$4 sm:$0xff]   ;;  %v5517_v30 = vld [vmem:[%s7510_s8 + $0x2ac] ss:$28 sps:$4 sm:$0xff]  }
 0x341   :  { %v2367_v27 = vadd.f32 %v2366_v20, %v2151_v14  ;;  %v2410_v28 = vadd.f32 %v2409_v22, %v2159_v15  ;;  %v2415_v37 = vmax.f32 %v2365_v24, 0.0  ;;  %v2417_v13 = vmax.f32 %v2408_v25, 0.0  ;;  %v5502_v14 = vld [vmem:[%s7510_s8 + $0x6d4] ss:$28 sps:$4 sm:$0xff]   ;;  %v5508_v20 = vld [vmem:[%s7510_s8 + $0x69c] ss:$28 sps:$4 sm:$0xff]  }
 0x342   :  { %v2368_v31 = vpop.f32.mrf.mxu0  ;;  %v2411_v32 = vpop.f32.mrf.mxu1  ;;  %v5497_v15 = vld [vmem:[%s7510_s8 + $0x350] ss:$28 sps:$4 sm:$0xff]   ;;  %v5503_v22 = vld [vmem:[%s7510_s8 + $0x318] ss:$28 sps:$4 sm:$0xff]   ;;  %v5511_v25 = vld [vmem:[%s7510_s8 + $0x2e4] ss:$28 sps:$4 sm:$0xff]  }
 0x343   :  { %v2369_v33 = vadd.f32 %v2368_v31, %v2155_v10  ;;  %v2412_v34 = vadd.f32 %v2411_v32, %v2163_v11  ;;  %v2418_v35 = vmax.f32 %v2367_v27, 0.0  ;;  %v2420_v36 = vmax.f32 %v2410_v28, 0.0  ;;  %v5494_v10 = vld [vmem:[%s7510_s8 + $0x388] ss:$28 sps:$4 sm:$0xff]   ;;  %v5499_v11 = vld [vmem:[%s7510_s8 + $0x354] ss:$28 sps:$4 sm:$0xff]  }
 0x344   :  { %v5506_v24 = vld [vmem:[%s7510_s8 + $0x698] ss:$28 sps:$4 sm:$0xff]   ;;  %v5514_v27 = vld [vmem:[%s7510_s8 + $0x664] ss:$28 sps:$4 sm:$0xff]   ;;  %v5520_v31 = vld [vmem:[%s7510_s8 + $0x62c] ss:$28 sps:$4 sm:$0xff]  }
 0x345   :  { %v2419_v38 = vmax.f32 %v2369_v33, 0.0  ;;  %v2421_v23 = vmax.f32 %v2412_v34, 0.0  ;;  %v6974_v45 = vpack.c.bf16 %v2418_v35, %v2414_v40  ;;  %v6976_v46 = vpack.c.bf16 %v2420_v36, %v2416_v41  ;;  %v5509_v28 = vld [vmem:[%s7510_s8 + $0x2e0] ss:$28 sps:$4 sm:$0xff]   ;;  %v5515_v32 = vld [vmem:[%s7510_s8 + $0x2a8] ss:$28 sps:$4 sm:$0xff]  }
 0x346   :  { %v5518_v33 = vld [vmem:[%s7510_s8 + $0x628] ss:$28 sps:$4 sm:$0xff]   ;;  %v5523_v34 = vld [vmem:[%s7510_s8 + $0x274] ss:$28 sps:$4 sm:$0xff]  }
 0x347   :  { %v6964_v42 = vpack.c.bf16 %v2419_v38, %v2415_v37  ;;  %v6966_v43 = vpack.c.bf16 %v2421_v23, %v2417_v13  ;;  %v5526_v35 = vld [vmem:[%s7510_s8 + $0x5f4] ss:$28 sps:$4 sm:$0xff]   ;;  %v5529_v13 = vld [vmem:[%s7510_s8 + $0x23c] ss:$28 sps:$4 sm:$0xff]   ;;  %v5535_v41 = vld [vmem:[%s7510_s8 + $0x204] ss:$28 sps:$4 sm:$0xff]  }
 0x348   :  { %v5521_v36 = vld [vmem:[%s7510_s8 + $0x270] ss:$28 sps:$4 sm:$0xff]   ;;  %v5532_v38 = vld [vmem:[%s7510_s8 + $0x5bc] ss:$28 sps:$4 sm:$0xff]  }
 0x349   :  { %3903 = vmatprep.mubr.bf16.mxu0 %v6964_v42  ;;  %3946 = vmatprep.mubr.bf16.mxu1 %v6966_v43  ;;  %v5524_v37 = vld [vmem:[%s7510_s8 + $0x5f0] ss:$28 sps:$4 sm:$0xff]   ;;  %v5527_v23 = vld [vmem:[%s7510_s8 + $0x238] ss:$28 sps:$4 sm:$0xff]  }
 0x34a   :  { %3904 = vmatmul.mubr.bf16.vlgmr.msra.gmra.mxu0 %v6974_v45  ;;  %3947 = vmatmul.mubr.bf16.vlgmr.msra.gmra.mxu1 %v6976_v46  ;;  %v5530_v40 = vld [vmem:[%s7510_s8 + $0x5b8] ss:$28 sps:$4 sm:$0xff]  }
 0x34b   :  { %3958 = vmatpush1.bf16.msra.mxu0 %v5449_v44  ;;  %4001 = vmatpush1.bf16.msra.mxu1 %v5452_v12  ;;  %v5538_v44 = vld [vmem:[%s7510_s8 + $0x584] ss:$28 sps:$4 sm:$0xff]  }
 0x34c   :  { %3989 = vmatprep.mubr.bf16.mxu0 %v6964_v42  ;;  %4032 = vmatprep.mubr.bf16.mxu1 %v6966_v43  ;;  %v5533_v12 = vld [vmem:[%s7510_s8 + $0x200] ss:$28 sps:$4 sm:$0xff]  }
 0x34d   :  { %3959 = vmatprep.subr.bf16.mxu0 %v5457_v47  ;;  %4002 = vmatprep.subr.bf16.mxu1 %v5460_v48  ;;  %v5536_v47 = vld [vmem:[%s7510_s8 + $0x580] ss:$28 sps:$4 sm:$0xff]   ;;  %v5541_v48 = vld [vmem:[%s7510_s8 + $0x1cc] ss:$28 sps:$4 sm:$0xff]  }
 0x34f   :  { %3960 = vmatpush1.bf16.msra.mxu0 %v5455_v49  ;;  %4003 = vmatpush1.bf16.msra.mxu1 %v5458_v50  ;;  %v5544_v49 = vld [vmem:[%s7510_s8 + $0x54c] ss:$28 sps:$4 sm:$0xff]  }
 0x350   :  { %3961 = vmatprep.subr.bf16.mxu0 %v5463_v51  ;;  %4004 = vmatprep.subr.bf16.mxu1 %v5466_v52  ;;  %v5539_v50 = vld [vmem:[%s7510_s8 + $0x1c8] ss:$28 sps:$4 sm:$0xff]   ;;  %v5547_v52 = vld [vmem:[%s7510_s8 + $0x19c] ss:$28 sps:$4 sm:$0xff]  }
 0x351   :  { %v5542_v51 = vld [vmem:[%s7510_s8 + $0x548] ss:$28 sps:$4 sm:$0xff]  }
 0x353   :  { %3962 = vmatpush1.bf16.msra.mxu0 %v5461_v53  ;;  %4005 = vmatpush1.bf16.msra.mxu1 %v5464_v55  ;;  %v5550_v53 = vld [vmem:[%s7510_s8 + $0x51c] ss:$28 sps:$4 sm:$0xff]  }
 0x354   :  { %3963 = vmatprep.subr.bf16.mxu0 %v5469_v56  ;;  %4006 = vmatprep.subr.bf16.mxu1 %v5472_v57  ;;  %v5545_v55 = vld [vmem:[%s7510_s8 + $0x198] ss:$28 sps:$4 sm:$0xff]   ;;  %v5553_v57 = vld [vmem:[%s7510_s8 + $0x164] ss:$28 sps:$4 sm:$0xff]  }
 0x355   :  { %v5548_v56 = vld [vmem:[%s7510_s8 + $0x518] ss:$28 sps:$4 sm:$0xff]  }
 0x357   :  { %3964 = vmatpush1.bf16.msra.mxu0 %v5467_v58  ;;  %4007 = vmatpush1.bf16.msra.mxu1 %v5470_v59  ;;  %v5556_v58 = vld [vmem:[%s7510_s8 + $0x4e4] ss:$28 sps:$4 sm:$0xff]  }
 0x358   :  { %3965 = vmatprep.subr.bf16.mxu0 %v5475_v60  ;;  %4008 = vmatprep.subr.bf16.mxu1 %v5478_v61  ;;  %v5551_v59 = vld [vmem:[%s7510_s8 + $0x160] ss:$28 sps:$4 sm:$0xff]   ;;  %v5559_v61 = vld [vmem:[%s7510_s8 + $0x12c] ss:$28 sps:$4 sm:$0xff]  }
 0x359   :  { %v5554_v60 = vld [vmem:[%s7510_s8 + $0x4e0] ss:$28 sps:$4 sm:$0xff]  }
 0x35b   :  { %3966 = vmatpush1.bf16.msra.mxu0 %v5473_v62  ;;  %4009 = vmatpush1.bf16.msra.mxu1 %v5476_v21  ;;  %v5562_v62 = vld [vmem:[%s7510_s8 + $0x4ac] ss:$28 sps:$4 sm:$0xff]  }
 0x35c   :  { %3967 = vmatprep.subr.bf16.mxu0 %v5481_v63  ;;  %4010 = vmatprep.subr.bf16.mxu1 %v5484_v0  ;;  %v5557_v21 = vld [vmem:[%s7510_s8 + $0x128] ss:$28 sps:$4 sm:$0xff]   ;;  %v5565_v0 = vld [vmem:[%s7510_s8 + $0xf4] ss:$28 sps:$4 sm:$0xff]  }
 0x35d   :  { %v5560_v63 = vld [vmem:[%s7510_s8 + $0x4a8] ss:$28 sps:$4 sm:$0xff]  }
 0x35f   :  { %3968 = vmatpush1.bf16.msra.mxu0 %v5479_v1  ;;  %4011 = vmatpush1.bf16.msra.mxu1 %v5482_v2  ;;  %v5568_v1 = vld [vmem:[%s7510_s8 + $0x474] ss:$28 sps:$4 sm:$0xff]  }
 0x360   :  { %3969 = vmatprep.subr.bf16.mxu0 %v5487_v3  ;;  %4012 = vmatprep.subr.bf16.mxu1 %v5490_v4  ;;  %v5563_v2 = vld [vmem:[%s7510_s8 + $0xf0] ss:$28 sps:$4 sm:$0xff]   ;;  %v5571_v4 = vld [vmem:[%s7510_s8 + $0xbc] ss:$28 sps:$4 sm:$0xff]  }
 0x361   :  { %v5566_v3 = vld [vmem:[%s7510_s8 + $0x470] ss:$28 sps:$4 sm:$0xff]  }
 0x363   :  { %3970 = vmatpush1.bf16.msra.mxu0 %v5485_v5  ;;  %4013 = vmatpush1.bf16.msra.mxu1 %v5488_v6  ;;  %v5574_v5 = vld [vmem:[%s7510_s8 + $0x43c] ss:$28 sps:$4 sm:$0xff]  }
 0x364   :  { %3971 = vmatprep.subr.bf16.mxu0 %v5493_v7  ;;  %4014 = vmatprep.subr.bf16.mxu1 %v5496_v8  ;;  %v5569_v6 = vld [vmem:[%s7510_s8 + $0xb8] ss:$28 sps:$4 sm:$0xff]   ;;  %v5577_v8 = vld [vmem:[%s7510_s8 + $0x84] ss:$28 sps:$4 sm:$0xff]  }
 0x365   :  { %v5572_v7 = vld [vmem:[%s7510_s8 + $0x438] ss:$28 sps:$4 sm:$0xff]  }
 0x367   :  { %3972 = vmatpush1.bf16.msra.mxu0 %v5491_v9  ;;  %4015 = vmatpush1.bf16.msra.mxu1 %v5494_v10  ;;  %v5580_v9 = vld [vmem:[%s7510_s8 + $0x404] ss:$28 sps:$4 sm:$0xff]  }
 0x368   :  { %3973 = vmatprep.subr.bf16.mxu0 %v5499_v11  ;;  %4016 = vmatprep.subr.bf16.mxu1 %v5502_v14  ;;  %v5575_v10 = vld [vmem:[%s7510_s8 + $0x80] ss:$28 sps:$4 sm:$0xff]   ;;  %v5583_v14 = vld [vmem:[%s7510_s8 + $0x4c] ss:$28 sps:$4 sm:$0xff]  }
 0x369   :  { %v5578_v11 = vld [vmem:[%s7510_s8 + $0x400] ss:$28 sps:$4 sm:$0xff]  }
 0x36b   :  { %3974 = vmatpush2.bf16.msra.mxu0 %v5497_v15  ;;  %4017 = vmatpush2.bf16.msra.mxu1 %v5500_v16  ;;  %v5586_v15 = vld [vmem:[%s7510_s8 + $0x3cc] ss:$28 sps:$4 sm:$0xff]  }
 0x36c   :  { %3975 = vmatprep.subr.bf16.mxu0 %v5505_v19  ;;  %4018 = vmatprep.subr.bf16.mxu1 %v5508_v20  ;;  %v5581_v16 = vld [vmem:[%s7510_s8 + $0x48] ss:$28 sps:$4 sm:$0xff]   ;;  %v5589_v20 = vld [vmem:[%s7510_s8 + $0x14] ss:$28 sps:$4 sm:$0xff]  }
 0x36d   :  { %v5584_v19 = vld [vmem:[%s7510_s8 + $0x3c8] ss:$28 sps:$4 sm:$0xff]  }
 0x36f   :  { %3976 = vmatpush2.bf16.msra.mxu0 %v5503_v22  ;;  %4019 = vmatpush2.bf16.msra.mxu1 %v5506_v24  ;;  %v5592_v22 = vld [vmem:[%s7510_s8 + $0x394] ss:$28 sps:$4 sm:$0xff]  }
 0x370   :  { %3977 = vmatprep.subr.bf16.mxu0 %v5511_v25  ;;  %4020 = vmatprep.subr.bf16.mxu1 %v5514_v27  ;;  %v5587_v24 = vld [vmem:[%s7510_s8 + $0x10] ss:$28 sps:$4 sm:$0xff]   ;;  %v5595_v27 = vld [vmem:[%s7510_s8 + $0x35c] ss:$28 sps:$4 sm:$0xff]  }
 0x371   :  { %v5590_v25 = vld [vmem:[%s7510_s8 + $0x390] ss:$28 sps:$4 sm:$0xff]  }
 0x373   :  { %3978 = vmatpush2.bf16.msra.mxu0 %v5509_v28  ;;  %4021 = vmatpush2.bf16.msra.mxu1 %v5512_v29  ;;  %v5598_v28 = vld [vmem:[%s7510_s8 + $0x6dc] ss:$28 sps:$4 sm:$0xff]  }
 0x374   :  { %3979 = vmatprep.subr.bf16.mxu0 %v5517_v30  ;;  %4022 = vmatprep.subr.bf16.mxu1 %v5520_v31  ;;  %v5593_v29 = vld [vmem:[%s7510_s8 + $0x358] ss:$28 sps:$4 sm:$0xff]   ;;  %v5601_v31 = vld [vmem:[%s7510_s8 + $0x324] ss:$28 sps:$4 sm:$0xff]  }
 0x375   :  { %v5596_v30 = vld [vmem:[%s7510_s8 + $0x6d8] ss:$28 sps:$4 sm:$0xff]  }
 0x377   :  { %3980 = vmatpush2.bf16.msra.mxu0 %v5515_v32  ;;  %4023 = vmatpush2.bf16.msra.mxu1 %v5518_v33  ;;  %v5604_v32 = vld [vmem:[%s7510_s8 + $0x6a4] ss:$28 sps:$4 sm:$0xff]  }
 0x378   :  { %3981 = vmatprep.subr.bf16.mxu0 %v5523_v34  ;;  %4024 = vmatprep.subr.bf16.mxu1 %v5526_v35  ;;  %v5599_v33 = vld [vmem:[%s7510_s8 + $0x320] ss:$28 sps:$4 sm:$0xff]   ;;  %v5607_v35 = vld [vmem:[%s7510_s8 + $0x2ec] ss:$28 sps:$4 sm:$0xff]  }
 0x379   :  { %v5602_v34 = vld [vmem:[%s7510_s8 + $0x6a0] ss:$28 sps:$4 sm:$0xff]  }
 0x37b   :  { %3982 = vmatpush2.bf16.msra.mxu0 %v5521_v36  ;;  %4025 = vmatpush2.bf16.msra.mxu1 %v5524_v37  ;;  %v5610_v36 = vld [vmem:[%s7510_s8 + $0x66c] ss:$28 sps:$4 sm:$0xff]  }
 0x37c   :  { %3983 = vmatprep.subr.bf16.mxu0 %v5529_v13  ;;  %4026 = vmatprep.subr.bf16.mxu1 %v5532_v38  ;;  %v5605_v37 = vld [vmem:[%s7510_s8 + $0x2e8] ss:$28 sps:$4 sm:$0xff]   ;;  %v5613_v38 = vld [vmem:[%s7510_s8 + $0x2b4] ss:$28 sps:$4 sm:$0xff]  }
 0x37d   :  { %v5608_v13 = vld [vmem:[%s7510_s8 + $0x668] ss:$28 sps:$4 sm:$0xff]  }
 0x37f   :  { %3984 = vmatpush2.bf16.msra.mxu0 %v5527_v23  ;;  %4027 = vmatpush2.bf16.msra.mxu1 %v5530_v40  ;;  %v5616_v23 = vld [vmem:[%s7510_s8 + $0x634] ss:$28 sps:$4 sm:$0xff]  }
 0x380   :  { %3985 = vmatprep.subr.bf16.mxu0 %v5535_v41  ;;  %4028 = vmatprep.subr.bf16.mxu1 %v5538_v44  ;;  %v5611_v40 = vld [vmem:[%s7510_s8 + $0x2b0] ss:$28 sps:$4 sm:$0xff]   ;;  %v5619_v44 = vld [vmem:[%s7510_s8 + $0x27c] ss:$28 sps:$4 sm:$0xff]  }
 0x381   :  { %v5614_v41 = vld [vmem:[%s7510_s8 + $0x630] ss:$28 sps:$4 sm:$0xff]  }
 0x383   :  { %3986 = vmatpush2.bf16.msra.mxu0 %v5533_v12  ;;  %4029 = vmatpush2.bf16.msra.mxu1 %v5536_v47  ;;  %v5622_v12 = vld [vmem:[%s7510_s8 + $0x5fc] ss:$28 sps:$4 sm:$0xff]  }
 0x384   :  { %3987 = vmatprep.subr.bf16.mxu0 %v5541_v48  ;;  %4030 = vmatprep.subr.bf16.mxu1 %v5544_v49  ;;  %v5617_v47 = vld [vmem:[%s7510_s8 + $0x278] ss:$28 sps:$4 sm:$0xff]   ;;  %v5625_v49 = vld [vmem:[%s7510_s8 + $0x244] ss:$28 sps:$4 sm:$0xff]  }
 0x385   :  { %v5620_v48 = vld [vmem:[%s7510_s8 + $0x5f8] ss:$28 sps:$4 sm:$0xff]  }
 0x387   :  { %3988 = vmatpush2.bf16.msra.mxu0 %v5539_v50  ;;  %4031 = vmatpush2.bf16.msra.mxu1 %v5542_v51  ;;  %v5628_v50 = vld [vmem:[%s7510_s8 + $0x5c4] ss:$28 sps:$4 sm:$0xff]  }
 0x388   :  { %4043 = vmatprep.subr.bf16.mxu0 %v5547_v52  ;;  %4086 = vmatprep.subr.bf16.mxu1 %v5550_v53  ;;  %v5623_v51 = vld [vmem:[%s7510_s8 + $0x240] ss:$28 sps:$4 sm:$0xff]   ;;  %v5631_v53 = vld [vmem:[%s7510_s8 + $0x20c] ss:$28 sps:$4 sm:$0xff]  }
 0x389   :  { %v5626_v52 = vld [vmem:[%s7510_s8 + $0x5c0] ss:$28 sps:$4 sm:$0xff]  }
 0x38a   :  { %3990 = vmatmul.mubr.bf16.vlgmr.msra.gmra.mxu0 %v6974_v45  ;;  %4033 = vmatmul.mubr.bf16.vlgmr.msra.gmra.mxu1 %v6976_v46 }
 0x38b   :  { %4044 = vmatpush1.bf16.msra.mxu0 %v5545_v55  ;;  %4075 = vmatprep.mubr.bf16.mxu0 %v6964_v42  ;;  %v5634_v55 = vld [vmem:[%s7510_s8 + $0x58c] ss:$28 sps:$4 sm:$0xff]  }
 0x38c   :  { %4087 = vmatpush1.bf16.msra.mxu1 %v5548_v56  ;;  %4118 = vmatprep.mubr.bf16.mxu1 %v6966_v43  ;;  %v5629_v56 = vld [vmem:[%s7510_s8 + $0x208] ss:$28 sps:$4 sm:$0xff]  }
 0x38d   :  { %4045 = vmatprep.subr.bf16.mxu0 %v5553_v57  ;;  %4088 = vmatprep.subr.bf16.mxu1 %v5556_v58  ;;  %v5632_v57 = vld [vmem:[%s7510_s8 + $0x588] ss:$28 sps:$4 sm:$0xff]   ;;  %v5637_v58 = vld [vmem:[%s7510_s8 + $0x1d4] ss:$28 sps:$4 sm:$0xff]  }
 0x38f   :  { %4046 = vmatpush1.bf16.msra.mxu0 %v5551_v59  ;;  %v5640_v59 = vld [vmem:[%s7510_s8 + $0x554] ss:$28 sps:$4 sm:$0xff]  }
 0x390   :  { %4089 = vmatpush1.bf16.msra.mxu1 %v5554_v60  ;;  %4047 = vmatprep.subr.bf16.mxu0 %v5559_v61  ;;  %v5635_v60 = vld [vmem:[%s7510_s8 + $0x1d0] ss:$28 sps:$4 sm:$0xff]  }
 0x391   :  { %4090 = vmatprep.subr.bf16.mxu1 %v5562_v62  ;;  %v5638_v61 = vld [vmem:[%s7510_s8 + $0x550] ss:$28 sps:$4 sm:$0xff]   ;;  %v5641_v62 = vld [vmem:[%s7510_s8 + $0x360] ss:$28 sps:$4 sm:$0xff]  }
 0x393   :  { %4048 = vmatpush1.bf16.msra.mxu0 %v5557_v21  ;;  %v5642_v21 = vld [vmem:[%s7510_s8 + $0x6e0] ss:$28 sps:$4 sm:$0xff]  }
 0x394   :  { %4091 = vmatpush1.bf16.msra.mxu1 %v5560_v63  ;;  %4049 = vmatprep.subr.bf16.mxu0 %v5565_v0  ;;  %v5643_v63 = vld [vmem:[%s7510_s8 + $0x1a0] ss:$28 sps:$4 sm:$0xff]  }
 0x395   :  { %4092 = vmatprep.subr.bf16.mxu1 %v5568_v1  ;;  %v5644_v0 = vld [vmem:[%s7510_s8 + $0x520] ss:$28 sps:$4 sm:$0xff]   ;;  %v5645_v1 = vld [vmem:[%s7510_s8 + $0x328] ss:$28 sps:$4 sm:$0xff]  }
 0x397   :  { %4050 = vmatpush1.bf16.msra.mxu0 %v5563_v2  ;;  %v5646_v2 = vld [vmem:[%s7510_s8 + $0x6a8] ss:$28 sps:$4 sm:$0xff]  }
 0x398   :  { %4093 = vmatpush1.bf16.msra.mxu1 %v5566_v3  ;;  %4051 = vmatprep.subr.bf16.mxu0 %v5571_v4  ;;  %v5647_v3 = vld [vmem:[%s7510_s8 + $0x168] ss:$28 sps:$4 sm:$0xff]  }
 0x399   :  { %4094 = vmatprep.subr.bf16.mxu1 %v5574_v5  ;;  %v5648_v4 = vld [vmem:[%s7510_s8 + $0x4e8] ss:$28 sps:$4 sm:$0xff]   ;;  %v5649_v5 = vld [vmem:[%s7510_s8 + $0x2f0] ss:$28 sps:$4 sm:$0xff]  }
 0x39b   :  { %4052 = vmatpush1.bf16.msra.mxu0 %v5569_v6  ;;  %v5650_v6 = vld [vmem:[%s7510_s8 + $0x670] ss:$28 sps:$4 sm:$0xff]  }
 0x39c   :  { %4095 = vmatpush1.bf16.msra.mxu1 %v5572_v7  ;;  %4053 = vmatprep.subr.bf16.mxu0 %v5577_v8  ;;  %v5652_v7 = vld [vmem:[%s7510_s8 + $0x4b0] ss:$28 sps:$4 sm:$0xff]   ;;  %v5654_v8 = vld [vmem:[%s7510_s8 + $0x638] ss:$28 sps:$4 sm:$0xff]  }
 0x39d   :  { %4096 = vmatprep.subr.bf16.mxu1 %v5580_v9  ;;  %v5655_v9 = vld [vmem:[%s7510_s8 + $0xf8] ss:$28 sps:$4 sm:$0xff]  }
 0x39f   :  { %4054 = vmatpush1.bf16.msra.mxu0 %v5575_v10  ;;  %v5656_v10 = vld [vmem:[%s7510_s8 + $0x478] ss:$28 sps:$4 sm:$0xff]  }
 0x3a0   :  { %4097 = vmatpush1.bf16.msra.mxu1 %v5578_v11  ;;  %4055 = vmatprep.subr.bf16.mxu0 %v5583_v14  ;;  %v5657_v11 = vld [vmem:[%s7510_s8 + $0x280] ss:$28 sps:$4 sm:$0xff]  }
 0x3a1   :  { %4098 = vmatprep.subr.bf16.mxu1 %v5586_v15  ;;  %v5658_v14 = vld [vmem:[%s7510_s8 + $0x600] ss:$28 sps:$4 sm:$0xff]  }
 0x3a2   :  { %v5659_v15 = vld [vmem:[%s7510_s8 + $0xc0] ss:$28 sps:$4 sm:$0xff]  }
 0x3a3   :  { %4056 = vmatpush1.bf16.msra.mxu0 %v5581_v16  ;;  %v5660_v16 = vld [vmem:[%s7510_s8 + $0x440] ss:$28 sps:$4 sm:$0xff]  }
 0x3a4   :  { %4099 = vmatpush1.bf16.msra.mxu1 %v5584_v19  ;;  %4057 = vmatprep.subr.bf16.mxu0 %v5589_v20  ;;  %v5661_v19 = vld [vmem:[%s7510_s8 + $0x248] ss:$28 sps:$4 sm:$0xff]  }
 0x3a5   :  { %4100 = vmatprep.subr.bf16.mxu1 %v5592_v22  ;;  %v5662_v20 = vld [vmem:[%s7510_s8 + $0x5c8] ss:$28 sps:$4 sm:$0xff]  }
 0x3a6   :  { %v5663_v22 = vld [vmem:[%s7510_s8 + $0x88] ss:$28 sps:$4 sm:$0xff]  }
 0x3a7   :  { %4058 = vmatpush1.bf16.msra.mxu0 %v5587_v24  ;;  %v5664_v24 = vld [vmem:[%s7510_s8 + $0x408] ss:$28 sps:$4 sm:$0xff]  }
 0x3a8   :  { %4101 = vmatpush1.bf16.msra.mxu1 %v5590_v25  ;;  %4059 = vmatprep.subr.bf16.mxu0 %v5595_v27  ;;  %v5665_v25 = vld [vmem:[%s7510_s8 + $0x210] ss:$28 sps:$4 sm:$0xff]  }
 0x3a9   :  { %4102 = vmatprep.subr.bf16.mxu1 %v5598_v28  ;;  %v5666_v27 = vld [vmem:[%s7510_s8 + $0x590] ss:$28 sps:$4 sm:$0xff]  }
 0x3aa   :  { %v5667_v28 = vld [vmem:[%s7510_s8 + $0x50] ss:$28 sps:$4 sm:$0xff]  }
 0x3ab   :  { %4060 = vmatpush2.bf16.msra.mxu0 %v5593_v29  ;;  %v5668_v29 = vld [vmem:[%s7510_s8 + $0x3d0] ss:$28 sps:$4 sm:$0xff]  }
 0x3ac   :  { %4103 = vmatpush2.bf16.msra.mxu1 %v5596_v30  ;;  %4061 = vmatprep.subr.bf16.mxu0 %v5601_v31  ;;  %v5669_v30 = vld [vmem:[%s7510_s8 + $0x1d8] ss:$28 sps:$4 sm:$0xff]  }
 0x3ad   :  { %4104 = vmatprep.subr.bf16.mxu1 %v5604_v32  ;;  %v5670_v31 = vld [vmem:[%s7510_s8 + $0x558] ss:$28 sps:$4 sm:$0xff]  }
 0x3ae   :  { %v5671_v32 = vld [vmem:[%s7510_s8 + $0x18] ss:$28 sps:$4 sm:$0xff]  }
 0x3af   :  { %4062 = vmatpush2.bf16.msra.mxu0 %v5599_v33  ;;  %v5672_v33 = vld [vmem:[%s7510_s8 + $0x398] ss:$28 sps:$4 sm:$0xff]  }
 0x3b0   :  { %4105 = vmatpush2.bf16.msra.mxu1 %v5602_v34  ;;  %4063 = vmatprep.subr.bf16.mxu0 %v5607_v35  ;;  %v7465_v34 = vld [vmem:[%s7515_s9] sm:$0x7f] }
 0x3b1   :  { %4106 = vmatprep.subr.bf16.mxu1 %v5610_v36  ;;  %v2687_v35 = vrot.slane %v7465_v34, %v6626_v39  ;;  %v2691_v36 = vrot.slane %v7465_v34, %v6623_v26 }
 0x3b3   :  { %4064 = vmatpush2.bf16.msra.mxu0 %v5605_v37 }
 0x3b4   :  { %4107 = vmatpush2.bf16.msra.mxu1 %v5608_v13  ;;  %4065 = vmatprep.subr.bf16.mxu0 %v5613_v38 }
 0x3b5   :  { %4108 = vmatprep.subr.bf16.mxu1 %v5616_v23 }
 0x3b7   :  { %4066 = vmatpush2.bf16.msra.mxu0 %v5611_v40 }
 0x3b8   :  { %4109 = vmatpush2.bf16.msra.mxu1 %v5614_v41  ;;  %4067 = vmatprep.subr.bf16.mxu0 %v5619_v44 }
 0x3b9   :  { %4110 = vmatprep.subr.bf16.mxu1 %v5622_v12 }
 0x3bb   :  { %4068 = vmatpush2.bf16.msra.mxu0 %v5617_v47 }
 0x3bc   :  { %4111 = vmatpush2.bf16.msra.mxu1 %v5620_v48  ;;  %4069 = vmatprep.subr.bf16.mxu0 %v5625_v49 }
 0x3bd   :  { %4112 = vmatprep.subr.bf16.mxu1 %v5628_v50 }
 0x3bf   :  { %4070 = vmatpush2.bf16.msra.mxu0 %v5623_v51 }
 0x3c0   :  { %4113 = vmatpush2.bf16.msra.mxu1 %v5626_v52  ;;  %4071 = vmatprep.subr.bf16.mxu0 %v5631_v53 }
 0x3c1   :  { %4114 = vmatprep.subr.bf16.mxu1 %v5634_v55 }
 0x3c3   :  { %4072 = vmatpush2.bf16.msra.mxu0 %v5629_v56 }
 0x3c4   :  { %4115 = vmatpush2.bf16.msra.mxu1 %v5632_v57  ;;  %4073 = vmatprep.subr.bf16.mxu0 %v5637_v58 }
 0x3c5   :  { %4116 = vmatprep.subr.bf16.mxu1 %v5640_v59 }
 0x3c7   :  { %4074 = vmatpush2.bf16.msra.mxu0 %v5635_v60 }
 0x3c8   :  { %4117 = vmatpush2.bf16.msra.mxu1 %v5638_v61  ;;  %4870 = vmatprep.subr.bf16.mxu0 %v5641_v62 }
 0x3c9   :  { %4892 = vmatprep.subr.bf16.mxu1 %v5642_v21 }
 0x3ca   :  { %4076 = vmatmul.mubr.bf16.vlgmr.msra.gmra.mxu0 %v6974_v45 }
 0x3cb   :  { %4119 = vmatmul.mubr.bf16.vlgmr.msra.gmra.mxu1 %v6976_v46  ;;  %4871 = vmatpush3.bf16.msra.mxu0 %v5643_v63 }
 0x3cc   :  { %4161 = vmatprep.mubr.bf16.mxu0 %v6964_v42  ;;  %4893 = vmatpush3.bf16.msra.mxu1 %v5644_v0  ;;  %v5651_v42 = vld [vmem:[%s7510_s8 + $0x130] ss:$28 sps:$4 sm:$0xff]  }
 0x3cd   :  { %4202 = vmatprep.mubr.bf16.mxu1 %v6966_v43  ;;  %4872 = vmatprep.subr.bf16.mxu0 %v5645_v1  ;;  %v5653_v43 = vld [vmem:[%s7510_s8 + $0x2b8] ss:$28 sps:$4 sm:$0xff]  }
 0x3ce   :  { %4894 = vmatprep.subr.bf16.mxu1 %v5646_v2 }
 0x3cf   :  { %4873 = vmatpush3.bf16.msra.mxu0 %v5647_v3 }
 0x3d0   :  { %4895 = vmatpush3.bf16.msra.mxu1 %v5648_v4  ;;  %4874 = vmatprep.subr.bf16.mxu0 %v5649_v5  ;;  %v2695_v5 = vrot.slane %v7465_v34, %v6638_v18 }
 0x3d1   :  { %4896 = vmatprep.subr.bf16.mxu1 %v5650_v6  ;;  %v2699_v6 = vrot.slane %v7465_v34, %v6635_v17 }
 0x3d3   :  { %4875 = vmatpush3.bf16.msra.mxu0 %v5651_v42 }
 0x3d4   :  { %4897 = vmatpush3.bf16.msra.mxu1 %v5652_v7  ;;  %4876 = vmatprep.subr.bf16.mxu0 %v5653_v43 }
 0x3d5   :  { %4898 = vmatprep.subr.bf16.mxu1 %v5654_v8 }
 0x3d7   :  { %4877 = vmatpush3.bf16.msra.mxu0 %v5655_v9 }
 0x3d8   :  { %4899 = vmatpush3.bf16.msra.mxu1 %v5656_v10  ;;  %4878 = vmatprep.subr.bf16.mxu0 %v5657_v11 }
 0x3d9   :  { %4900 = vmatprep.subr.bf16.mxu1 %v5658_v14 }
 0x3db   :  { %4879 = vmatpush3.bf16.msra.mxu0 %v5659_v15 }
 0x3dc   :  { %4901 = vmatpush3.bf16.msra.mxu1 %v5660_v16  ;;  %4880 = vmatprep.subr.bf16.mxu0 %v5661_v19 }
 0x3dd   :  { %4902 = vmatprep.subr.bf16.mxu1 %v5662_v20 }
 0x3df   :  { %4881 = vmatpush3.bf16.msra.mxu0 %v5663_v22 }
 0x3e0   :  { %4903 = vmatpush3.bf16.msra.mxu1 %v5664_v24  ;;  %4882 = vmatprep.subr.bf16.mxu0 %v5665_v25 }
 0x3e1   :  { %4904 = vmatprep.subr.bf16.mxu1 %v5666_v27 }
 0x3e3   :  { %4883 = vmatpush3.bf16.msra.mxu0 %v5667_v28 }
 0x3e4   :  { %4905 = vmatpush3.bf16.msra.mxu1 %v5668_v29  ;;  %4884 = vmatprep.subr.bf16.mxu0 %v5669_v30 }
 0x3e5   :  { %4906 = vmatprep.subr.bf16.mxu1 %v5670_v31 }
 0x3e7   :  { %4885 = vmatpush3.bf16.msra.mxu0 %v5671_v32 }
 0x3e8   :  { %4907 = vmatpush3.bf16.msra.mxu1 %v5672_v33 }
 0x3ea   :  { %4162 = vmatmul.mubr.bf16.vlgmr.msra.gmra.mxu0 %v6974_v45 }
 0x3eb   :  { %4203 = vmatmul.mubr.bf16.vlgmr.msra.gmra.mxu1 %v6976_v46 }
 0x40a   :  { %v3905_v37 = vpop.f32.mrf.mxu0  ;;  %v3948_v13 = vpop.f32.mrf.mxu1 }
 0x40b   :  { %v3906_v38 = vadd.f32 %v3905_v37, %v2687_v35 }
 0x40c   :  { %v3907_v23 = vpop.f32.mrf.mxu0  ;;  %v3950_v40 = vpop.f32.mrf.mxu1 }
 0x40d   :  { %v3949_v41 = vadd.f32 %v3948_v13, %v3906_v38  ;;  %v3908_v45 = vadd.f32 %v3907_v23, %v2691_v36 }
 0x40e   :  { %v3909_v44 = vpop.f32.mrf.mxu0  ;;  %v3952_v46 = vpop.f32.mrf.mxu1 }
 0x40f   :  { %v4211_v12 = vmul.f32 0.5, %v3949_v41  ;;  %v3951_v47 = vadd.f32 %v3950_v40, %v3908_v45  ;;  %v3910_v48 = vadd.f32 %v3909_v44, %v2687_v35 }
 0x410   :  { %v3911_v49 = vpop.f32.mrf.mxu0  ;;  %v3954_v52 = vpop.f32.mrf.mxu1 }
 0x411   :  { %5677 = vtanh.f32 %v4211_v12  ;;  %v4212_v50 = vmul.f32 0.5, %v3951_v47  ;;  %v3953_v51 = vadd.f32 %v3952_v46, %v3910_v48  ;;  %v3912_v39 = vadd.f32 %v3911_v49, %v2691_v36 }
 0x412   :  { %v2702_v46 = vsub.s32 4, %v6620_v54  ;;  %v2706_v12 = vsub.s32 5, %v6620_v54 }
 0x413   :  { %5679 = vtanh.f32 %v4212_v50  ;;  %v4218_v26 = vmul.f32 0.5, %v3953_v51  ;;  %v3955_v53 = vadd.f32 %v3954_v52, %v3912_v39 }
 0x414   :  { %v2703_v47 = vrot.slane %v7465_v34, %v2702_v46  ;;  %v2707_v48 = vrot.slane %v7465_v34, %v2706_v12 }
 0x415   :  { %5681 = vtanh.f32 %v4218_v26  ;;  %v4219_v55 = vmul.f32 0.5, %v3955_v53 }
 0x417   :  { %5683 = vtanh.f32 %v4219_v55 }
 0x41e   :  { %v5678_v56 = vpop.eup %5677 }
 0x41f   :  { %v4239_v57 = vmul.f32 0.5, %v5678_v56 }
 0x420   :  { %v5680_v58 = vpop.eup %5679 }
 0x421   :  { %v4240_v59 = vmul.f32 0.5, %v5680_v58  ;;  %v4253_v61 = vadd.f32 0.5, %v4239_v57 }
 0x422   :  { %v5682_v60 = vpop.eup %5681 }
 0x423   :  { %v4254_v62 = vadd.f32 0.5, %v4240_v59  ;;  %v4246_v21 = vmul.f32 0.5, %v5682_v60 }
 0x424   :  { %v5684_v63 = vpop.eup %5683 }
 0x425   :  { %v4858_v0 = vpack.c.bf16 %v4254_v62, %v4253_v61  ;;  %v4247_v1 = vmul.f32 0.5, %v5684_v63  ;;  %v4260_v2 = vadd.f32 0.5, %v4246_v21 }
 0x427   :  { %4311 = vst [vmem:[%s7516_s10] sm:$0xff] %v4858_v0  ;;  %v4261_v3 = vadd.f32 0.5, %v4247_v1 }
 0x429   :  { %v4862_v4 = vpack.c.bf16 %v4261_v3, %v4260_v2 }
 0x42b   :  { %4316 = vst [vmem:[%s7516_s10 + $0x1c] sm:$0xff] %v4862_v4 }
 0x44a   :  { %v3991_v42 = vpop.f32.mrf.mxu0  ;;  %v4034_v7 = vpop.f32.mrf.mxu1 }
 0x44b   :  { %v3992_v43 = vadd.f32 %v3991_v42, %v2695_v5 }
 0x44c   :  { %v3993_v8 = vpop.f32.mrf.mxu0  ;;  %v4036_v9 = vpop.f32.mrf.mxu1 }
 0x44d   :  { %v4035_v10 = vadd.f32 %v4034_v7, %v3992_v43  ;;  %v3994_v11 = vadd.f32 %v3993_v8, %v2699_v6 }
 0x44e   :  { %v3995_v14 = vpop.f32.mrf.mxu0  ;;  %v4038_v15 = vpop.f32.mrf.mxu1 }
 0x44f   :  { %v4213_v16 = vmul.f32 0.5, %v4035_v10  ;;  %v4037_v19 = vadd.f32 %v4036_v9, %v3994_v11  ;;  %v3996_v20 = vadd.f32 %v3995_v14, %v2695_v5 }
 0x450   :  { %v3997_v22 = vpop.f32.mrf.mxu0  ;;  %v4040_v27 = vpop.f32.mrf.mxu1 }
 0x451   :  { %5685 = vtanh.f32 %v4213_v16  ;;  %v4214_v24 = vmul.f32 0.5, %v4037_v19  ;;  %v4039_v25 = vadd.f32 %v4038_v15, %v3996_v20  ;;  %v3998_v18 = vadd.f32 %v3997_v22, %v2699_v6 }
 0x452   :  { %v2710_v16 = vsub.s32 6, %v6620_v54 }
 0x453   :  { %5687 = vtanh.f32 %v4214_v24  ;;  %v4220_v17 = vmul.f32 0.5, %v4039_v25  ;;  %v4041_v28 = vadd.f32 %v4040_v27, %v3998_v18 }
 0x454   :  { %v2711_v24 = vrot.slane %v7465_v34, %v2710_v16 }
 0x455   :  { %5689 = vtanh.f32 %v4220_v17  ;;  %v4221_v29 = vmul.f32 0.5, %v4041_v28 }
 0x457   :  { %5691 = vtanh.f32 %v4221_v29 }
 0x45e   :  { %v5686_v30 = vpop.eup %5685 }
 0x45f   :  { %v4241_v31 = vmul.f32 0.5, %v5686_v30 }
 0x460   :  { %v5688_v32 = vpop.eup %5687 }
 0x461   :  { %v4242_v33 = vmul.f32 0.5, %v5688_v32  ;;  %v4255_v36 = vadd.f32 0.5, %v4241_v31 }
 0x462   :  { %v5690_v35 = vpop.eup %5689 }
 0x463   :  { %v4256_v37 = vadd.f32 0.5, %v4242_v33  ;;  %v4248_v13 = vmul.f32 0.5, %v5690_v35 }
 0x464   :  { %v5692_v38 = vpop.eup %5691 }
 0x465   :  { %v4859_v23 = vpack.c.bf16 %v4256_v37, %v4255_v36  ;;  %v4249_v40 = vmul.f32 0.5, %v5692_v38  ;;  %v4262_v41 = vadd.f32 0.5, %v4248_v13 }
 0x467   :  { %4312 = vst [vmem:[%s7516_s10 + $0x8] sm:$0xff] %v4859_v23  ;;  %v4263_v45 = vadd.f32 0.5, %v4249_v40 }
 0x469   :  { %v4863_v44 = vpack.c.bf16 %v4263_v45, %v4262_v41 }
 0x46b   :  { %4317 = vst [vmem:[%s7516_s10 + $0x24] sm:$0xff] %v4863_v44 }
 0x48a   :  { %v4077_v49 = vpop.f32.mrf.mxu0 }
 0x48b   :  { %v4078_v50 = vadd.f32 %v4077_v49, %v2703_v47  ;;  %v4120_v51 = vpop.f32.mrf.mxu1 }
 0x48c   :  { %v4079_v39 = vpop.f32.mrf.mxu0 }
 0x48d   :  { %v4121_v52 = vadd.f32 %v4120_v51, %v4078_v50  ;;  %v4080_v26 = vadd.f32 %v4079_v39, %v2707_v48  ;;  %v4122_v53 = vpop.f32.mrf.mxu1 }
 0x48e   :  { %v4081_v55 = vpop.f32.mrf.mxu0 }
 0x48f   :  { %v4215_v56 = vmul.f32 0.5, %v4121_v52  ;;  %v4123_v57 = vadd.f32 %v4122_v53, %v4080_v26  ;;  %v4082_v58 = vadd.f32 %v4081_v55, %v2703_v47  ;;  %v4124_v59 = vpop.f32.mrf.mxu1 }
 0x490   :  { %v4083_v60 = vpop.f32.mrf.mxu0 }
 0x491   :  { %5693 = vtanh.f32 %v4215_v56  ;;  %v4216_v61 = vmul.f32 0.5, %v4123_v57  ;;  %v4125_v62 = vadd.f32 %v4124_v59, %v4082_v58  ;;  %v4084_v21 = vadd.f32 %v4083_v60, %v2707_v48  ;;  %v4126_v63 = vpop.f32.mrf.mxu1 }
 0x493   :  { %5695 = vtanh.f32 %v4216_v61  ;;  %v4222_v0 = vmul.f32 0.5, %v4125_v62  ;;  %v4127_v1 = vadd.f32 %v4126_v63, %v4084_v21 }
 0x495   :  { %5697 = vtanh.f32 %v4222_v0  ;;  %v4223_v2 = vmul.f32 0.5, %v4127_v1 }
 0x497   :  { %5699 = vtanh.f32 %v4223_v2 }
 0x49e   :  { %v5694_v3 = vpop.eup %5693 }
 0x49f   :  { %v4243_v4 = vmul.f32 0.5, %v5694_v3 }
 0x4a0   :  { %v5696_v5 = vpop.eup %5695 }
 0x4a1   :  { %v4244_v6 = vmul.f32 0.5, %v5696_v5  ;;  %v4257_v7 = vadd.f32 0.5, %v4243_v4 }
 0x4a2   :  { %v5698_v42 = vpop.eup %5697 }
 0x4a3   :  { %v4258_v43 = vadd.f32 0.5, %v4244_v6  ;;  %v4250_v8 = vmul.f32 0.5, %v5698_v42 }
 0x4a4   :  { %v5700_v9 = vpop.eup %5699 }
 0x4a5   :  { %v4860_v10 = vpack.c.bf16 %v4258_v43, %v4257_v7  ;;  %v4251_v11 = vmul.f32 0.5, %v5700_v9  ;;  %v4264_v14 = vadd.f32 0.5, %v4250_v8 }
 0x4a7   :  { %4313 = vst [vmem:[%s7516_s10 + $0x10] sm:$0xff] %v4860_v10  ;;  %v4265_v15 = vadd.f32 0.5, %v4251_v11 }
 0x4a9   :  { %v4864_v19 = vpack.c.bf16 %v4265_v15, %v4264_v14 }
 0x4aa   :  { %v4886_v20 = vpop.f32.mrf.mxu0 }
 0x4ab   :  { %4318 = vst [vmem:[%s7516_s10 + $0x2c] sm:$0xff] %v4864_v19  ;;  %v4908_v22 = vpop.f32.mrf.mxu1 }
 0x4ac   :  { %v4887_v25 = vpop.f32.mrf.mxu0 }
 0x4ad   :  { %v4888_v18 = vadd.f32 %v4887_v25, %v4886_v20  ;;  %v4909_v27 = vpop.f32.mrf.mxu1 }
 0x4ae   :  { %v4889_v17 = vpop.f32.mrf.mxu0  ;;  %v4910_v29 = vadd.f32 %v4909_v27, %v4908_v22 }
 0x4af   :  { %v4164_v28 = vadd.f32 %v4888_v18, %v2711_v24  ;;  %v4911_v30 = vpop.f32.mrf.mxu1 }
 0x4b0   :  { %v4890_v31 = vpop.f32.mrf.mxu0 }
 0x4b1   :  { %v4205_v32 = vadd.f32 %v4910_v29, %v4164_v28  ;;  %v4891_v33 = vadd.f32 %v4890_v31, %v4889_v17  ;;  %v4912_v54 = vpop.f32.mrf.mxu1 }
 0x4b2   :  { %v4913_v37 = vadd.f32 %v4912_v54, %v4911_v30 }
 0x4b3   :  { %v4217_v35 = vmul.f32 0.5, %v4205_v32  ;;  %v4167_v36 = vadd.f32 %v4891_v33, %v2711_v24 }
 0x4b5   :  { %5701 = vtanh.f32 %v4217_v35  ;;  %v4208_v13 = vadd.f32 %v4913_v37, %v4167_v36 }
 0x4b7   :  { %v4224_v38 = vmul.f32 0.5, %v4208_v13 }
 0x4b9   :  { %5703 = vtanh.f32 %v4224_v38 }
 0x4c2   :  { %v5702_v23 = vpop.eup %5701 }
 0x4c3   :  { %v4245_v34 = vmul.f32 0.5, %v5702_v23 }
 0x4c5   :  { %v4259_v40 = vadd.f32 0.5, %v4245_v34 }
 0x4c6   :  { %v5704_v41 = vpop.eup %5703 }
 0x4c7   :  { %v4861_v45 = vpack.c.bf16 %v4259_v40, %v4259_v40  ;;  %v4252_v44 = vmul.f32 0.5, %v5704_v41 }
 0x4c9   :  { %4315 = vst.msk [vmem:[%s7516_s10 + $0x18] sm:$0xf] %vm4314_vm1, %v4861_v45  ;;  %v4266_v46 = vadd.f32 0.5, %v4252_v44 }
 0x4cb   :  { %v4865_v12 = vpack.c.bf16 %v4266_v46, %v4266_v46 }
 0x4cd   :  { %4319 = vst.msk [vmem:[%s7516_s10 + $0x34] sm:$0xf] %vm4314_vm1, %v4865_v12 }

</bundles_post_ra>
